<compile_context>
chip_gen: v5e
topology: v5e:2x2
jax: 0.10.0
libtpu: 0.0.40
codegen_flags: <defaults>
</compile_context>

<pallas_src>
import functools

import jax
import jax.numpy as jnp
from jax import lax
from jax.experimental import pallas as pl
from jax.experimental.pallas import tpu as pltpu

_SUBLANE = 8
_LANE = 128
_NEG_BIG = jnp.float32(-1e30)        # bias for padded output classes -> exp() ~ 0
_GATE_PERM = (0, 1, 3, 2)            # torch [i, f, g, o] -> kernel [i, f, o, g]


def _round_up(x, m):
    return (x + m - 1) // m * m


def _lstm_kernel(x_ref, h0_ref, c0_ref, wih_ref, whh_ref, b_ref, wl_ref, bl_ref,
                 out_ref, hn_ref, cn_ref, gx_sc, hs_sc,
                 *, chunk, batch, hidden, total_steps, mask_tail):
    """One time-chunk of the LSTM forward.

    x_ref   : (Tc*B, I)   this chunk's inputs (time-flattened, batch padded)
    h0/c0   : (B, H)      initial state (padded), read only at chunk 0
    wih_ref : (I, 4H)     W_ih^T, gate order [i,f,o,g], padded
    whh_ref : (H, 4H)     W_hh^T, gate order [i,f,o,g], padded
    b_ref   : (1, 4H)     b_ih + b_hh (padded)
    wl_ref  : (H, O)      W_lin^T (padded)
    bl_ref  : (1, O)      b_lin (padded classes get -1e30)
    out_ref : (Tc*B, O)   this chunk's log-softmax output (pipelined back)
    hn/cn   : (B, H)      recurrence state; constant block index -> resident
                          across grid steps, written to HBM once at the end
    gx_sc   : (Tc*B, 4H)  VMEM scratch: input projection for this chunk
    hs_sc   : (Tc*B, H)   VMEM scratch: hidden states for this chunk
    """
    Tc, B, H = chunk, batch, hidden
    ci = pl.program_id(0)

    # Seed the resident state from (h0, c0) at the first chunk.
    @pl.when(ci == 0)
    def _():
        hn_ref[...] = h0_ref[...]
        cn_ref[...] = c0_ref[...]

    # ---- Phase 1 (per chunk): input projection for Tc timesteps in one MXU
    # matmul, (b_ih + b_hh) folded in once.
    gx_sc[...] = jnp.dot(x_ref[...], wih_ref[...],
                         preferred_element_type=jnp.float32) + b_ref[...]

    whh = whh_ref[...]          # hoist recurrent-weight load out of the loop

    # ---- Phase 2: serial recurrence over the chunk.  Tc is small and static,
    # so the fori_loop is unrolled (LLO visibility) while keeping every slice
    # sublane/lane aligned (B % 8 == 0, H % 128 == 0).
    def step(t, carry):
        h, c = carry
        row = pl.multiple_of(t * B, _SUBLANE)
        gates = gx_sc[pl.ds(row, B), :] + jnp.dot(
            h, whh, preferred_element_type=jnp.float32)
        # Gate order [i, f, o, g]: one contiguous sigmoid, one tanh.
        sig = jax.nn.sigmoid(gates[:, :3 * H])
        i_g = sig[:, 0 * H:1 * H]
        f_g = sig[:, 1 * H:2 * H]
        o_g = sig[:, 2 * H:3 * H]
        g_g = jnp.tanh(gates[:, 3 * H:4 * H])
        c_new = f_g * c + i_g * g_g
        h_new = o_g * jnp.tanh(c_new)
        if mask_tail:               # trace-time switch: only if T was padded
            valid = (ci * Tc + t) < total_steps
            c_new = jnp.where(valid, c_new, c)
            h_new = jnp.where(valid, h_new, h)
        hs_sc[pl.ds(row, B), :] = h_new
        return h_new, c_new

    h, c = lax.fori_loop(0, Tc, step, (hn_ref[...], cn_ref[...]), unroll=True)
    hn_ref[...] = h
    cn_ref[...] = c

    # ---- Phase 3 (per chunk): output head + log-softmax, one MXU matmul and
    # one lane-dense store into the pipelined output block.
    logits = jnp.dot(hs_sc[...], wl_ref[...],
                     preferred_element_type=jnp.float32) + bl_ref[...]
    m = jnp.max(logits, axis=-1, keepdims=True)
    lse = m + jnp.log(jnp.sum(jnp.exp(logits - m), axis=-1, keepdims=True))
    out_ref[...] = logits - lse


def my_lstm_forward(x, hidden, params, *, time_chunk=8):
    """Pallas equivalent of MyLSTM.forward.

    x:      (T, B, I) or (B, I)  -> unsqueezed to (1, B, I)
    hidden: (h0, c0), each (1, B, H)
    returns (log_probs (T, B, O), (h_n, c_n))
    """
    if x.ndim == 2:
        x = x[None]                     # matches input.unsqueeze(dim=0)
    h0, c0 = hidden
    T, B, I = x.shape
    H = h0.shape[-1]

    w_ih, w_hh, b_ih, b_hh, w_lin, b_lin = (
        params["w_ih"], params["w_hh"], params["b_ih"], params["b_hh"],
        params["w_lin"], params["b_lin"])
    O = w_lin.shape[0]

    Tc = max(1, min(int(time_chunk), T))
    Tp = _round_up(T, Tc)
    n_chunks = Tp // Tc
    mask_tail = Tp != T

    Bp = _round_up(B, _SUBLANE)
    Hp = _round_up(H, _LANE)
    Op = _round_up(O, _LANE)
    Ip = _round_up(I, _LANE)
    f32 = jnp.float32
    perm = jnp.array(_GATE_PERM)

    # ---- Pad / reorder everything at the wrapper so the kernel only ever
    # touches (8,128)-aligned blocks.  Zero padding is exact in f32.
    x_p = jnp.zeros((Tp, Bp, Ip), f32).at[:T, :B, :I].set(x.astype(f32))
    x2 = x_p.reshape(Tp * Bp, Ip)                        # (Tp*Bp, Ip)

    def pad_gates(w, K, Kp):                             # (4H, K) -> (Kp, 4Hp)^T
        w4 = w.astype(f32).reshape(4, H, K)[perm]        # gate order [i,f,o,g]
        w4p = jnp.zeros((4, Hp, Kp), f32).at[:, :H, :K].set(w4)
        return w4p.reshape(4 * Hp, Kp).T

    wih_t = pad_gates(w_ih, I, Ip)                       # (Ip, 4Hp)
    whh_t = pad_gates(w_hh, H, Hp)                       # (Hp, 4Hp)

    b4 = (b_ih + b_hh).astype(f32).reshape(4, H)[perm]
    b_p = jnp.zeros((4, Hp), f32).at[:, :H].set(b4).reshape(1, 4 * Hp)

    wl_t = jnp.zeros((Op, Hp), f32).at[:O, :H].set(w_lin.astype(f32)).T  # (Hp, Op)
    bl_p = jnp.full((1, Op), _NEG_BIG, f32).at[0, :O].set(b_lin.astype(f32))

    h0_p = jnp.zeros((Bp, Hp), f32).at[:B, :H].set(h0[0].astype(f32))
    c0_p = jnp.zeros((Bp, Hp), f32).at[:B, :H].set(c0[0].astype(f32))

    # ---- VMEM budget: weights/biases/state (possibly double-buffered),
    # pipelined x / out chunk buffers, and the two chunk-sized scratches.
    est_bytes = 4 * (
        2 * (Ip * 4 * Hp + Hp * 4 * Hp + 4 * Hp + Hp * Op + Op + 2 * Bp * Hp)
        + 2 * Tc * Bp * (Ip + Op)          # double-buffered x / out chunks
        + 2 * 2 * Bp * Hp                  # hn / cn output blocks
        + Tc * Bp * (4 * Hp + Hp))         # gx_sc + hs_sc scratch
    vmem_limit = int(min(100 * 2**20, max(32 * 2**20, 2 * est_bytes)))

    kernel = functools.partial(_lstm_kernel, chunk=Tc, batch=Bp, hidden=Hp,
                               total_steps=T, mask_tail=mask_tail)

    out, h_n, c_n = pl.pallas_call(
        kernel,
        out_shape=(
            jax.ShapeDtypeStruct((Tp * Bp, Op), f32),
            jax.ShapeDtypeStruct((Bp, Hp), f32),
            jax.ShapeDtypeStruct((Bp, Hp), f32),
        ),
        grid_spec=pltpu.PrefetchScalarGridSpec(
            num_scalar_prefetch=0,
            grid=(n_chunks,),                                    # time chunks
            in_specs=[
                pl.BlockSpec((Tc * Bp, Ip), lambda c: (c, 0)),   # x chunk
                pl.BlockSpec((Bp, Hp), lambda c: (0, 0)),        # h0 (resident)
                pl.BlockSpec((Bp, Hp), lambda c: (0, 0)),        # c0 (resident)
                pl.BlockSpec((Ip, 4 * Hp), lambda c: (0, 0)),    # W_ih^T
                pl.BlockSpec((Hp, 4 * Hp), lambda c: (0, 0)),    # W_hh^T
                pl.BlockSpec((1, 4 * Hp), lambda c: (0, 0)),     # bias
                pl.BlockSpec((Hp, Op), lambda c: (0, 0)),        # W_lin^T
                pl.BlockSpec((1, Op), lambda c: (0, 0)),         # b_lin
            ],
            out_specs=[
                pl.BlockSpec((Tc * Bp, Op), lambda c: (c, 0)),   # log-prob chunk
                pl.BlockSpec((Bp, Hp), lambda c: (0, 0)),        # h_n (state)
                pl.BlockSpec((Bp, Hp), lambda c: (0, 0)),        # c_n (state)
            ],
            scratch_shapes=[
                pltpu.VMEM((Tc * Bp, 4 * Hp), jnp.float32),      # gates_x chunk
                pltpu.VMEM((Tc * Bp, Hp), jnp.float32),          # h_t chunk
            ],
        ),
        compiler_params=pltpu.CompilerParams(
            dimension_semantics=("arbitrary",),                  # recurrence
            vmem_limit_bytes=vmem_limit),
    )(x2, h0_p, c0_p, wih_t, whh_t, b_p, wl_t, bl_p)

    out = out.reshape(Tp, Bp, Op)[:T, :B, :O]
    h_n = h_n[:B, :H][None]
    c_n = c_n[:B, :H][None]
    return out, (h_n, c_n)


def _reference_forward(x, hidden, params):
    """Pure-JAX reference replicating torch.nn.LSTM + Linear + LogSoftmax."""
    if x.ndim == 2:
        x = x[None]
    h, c = hidden[0][0], hidden[1][0]
    H = h.shape[-1]
    w_ih, w_hh = params["w_ih"], params["w_hh"]
    b = params["b_ih"] + params["b_hh"]
    outs = []
    for t in range(x.shape[0]):
        gates = x[t] @ w_ih.T + h @ w_hh.T + b
        i = jax.nn.sigmoid(gates[:, 0 * H:1 * H])
        f = jax.nn.sigmoid(gates[:, 1 * H:2 * H])
        g = jnp.tanh(gates[:, 2 * H:3 * H])
        o = jax.nn.sigmoid(gates[:, 3 * H:4 * H])
        c = f * c + i * g
        h = o * jnp.tanh(c)
        outs.append(h)
    hs = jnp.stack(outs)                                   # (T, B, H)
    logits = hs @ params["w_lin"].T + params["b_lin"]      # (T, B, O)
    logp = jax.nn.log_softmax(logits, axis=-1)
    return logp, (h[None], c[None])


if __name__ == "__main__":
    # Small shapes consistent with MyLSTM(input_size, hidden_size, output_size)
    T, B = 8, 2
    input_size, hidden_size, output_size = 16, 32, 10

    key = jax.random.PRNGKey(0)
    keys = jax.random.split(key, 9)
    s = 1.0 / jnp.sqrt(hidden_size)

    params = {
        "w_ih": jax.random.uniform(keys[0], (4 * hidden_size, input_size),
                                   jnp.float32, -s, s),
        "w_hh": jax.random.uniform(keys[1], (4 * hidden_size, hidden_size),
                                   jnp.float32, -s, s),
        "b_ih": jax.random.uniform(keys[2], (4 * hidden_size,),
                                   jnp.float32, -s, s),
        "b_hh": jax.random.uniform(keys[3], (4 * hidden_size,),
                                   jnp.float32, -s, s),
        "w_lin": jax.random.uniform(keys[4], (output_size, hidden_size),
                                    jnp.float32, -s, s),
        "b_lin": jax.random.uniform(keys[5], (output_size,),
                                    jnp.float32, -s, s),
    }

    x = jax.random.normal(keys[6], (T, B, input_size), jnp.float32)
    h0 = jax.random.normal(keys[7], (1, B, hidden_size), jnp.float32)
    c0 = jax.random.normal(keys[8], (1, B, hidden_size), jnp.float32)

    # time_chunk=4 -> grid=(2,): exercises the pipelined multi-chunk path.
    out, (h_n, c_n) = my_lstm_forward(x, (h0, c0), params, time_chunk=4)
    jax.block_until_ready((out, h_n, c_n))

    ref_out, (ref_h, ref_c) = _reference_forward(x, (h0, c0), params)
    assert out.shape == (T, B, output_size)
    assert h_n.shape == (1, B, hidden_size) and c_n.shape == (1, B, hidden_size)
    assert jnp.allclose(out, ref_out, atol=1e-5, rtol=1e-5)
    assert jnp.allclose(h_n, ref_h, atol=1e-5, rtol=1e-5)
    assert jnp.allclose(c_n, ref_c, atol=1e-5, rtol=1e-5)

    print("KERNEL_OK")
</pallas_src>

<mosaic_0001>
module attributes {stable_mosaic.version = 11 : i64} {
  func.func @_lstm_kernel(%arg0: i32, %arg1: memref<32x128xf32, #tpu.memory_space<vmem>>, %arg2: memref<8x128xf32, #tpu.memory_space<vmem>>, %arg3: memref<8x128xf32, #tpu.memory_space<vmem>>, %arg4: memref<128x512xf32, #tpu.memory_space<vmem>>, %arg5: memref<128x512xf32, #tpu.memory_space<vmem>>, %arg6: memref<1x512xf32, #tpu.memory_space<vmem>>, %arg7: memref<128x128xf32, #tpu.memory_space<vmem>>, %arg8: memref<1x128xf32, #tpu.memory_space<vmem>>, %arg9: memref<32x128xf32, #tpu.memory_space<vmem>>, %arg10: memref<8x128xf32, #tpu.memory_space<vmem>>, %arg11: memref<8x128xf32, #tpu.memory_space<vmem>>, %arg12: memref<32x512xf32, #tpu.memory_space<vmem>>, %arg13: memref<32x128xf32, #tpu.memory_space<vmem>>) attributes {dimension_semantics = [#tpu.dimension_semantics<arbitrary>], iteration_bounds = array<i64: 2>, scalar_prefetch = 0 : i64, scratch_operands = 2 : i64, tpu.core_type = #tpu.core_type<tc>, window_params = [{transform_indices = @transform_0, window_bounds = array<i64: 32, 128>}, {pipeline_mode = #tpu.pipeline_mode<synchronous>, transform_indices = @transform_1, window_bounds = array<i64: 8, 128>}, {pipeline_mode = #tpu.pipeline_mode<synchronous>, transform_indices = @transform_2, window_bounds = array<i64: 8, 128>}, {pipeline_mode = #tpu.pipeline_mode<synchronous>, transform_indices = @transform_3, window_bounds = array<i64: 128, 512>}, {pipeline_mode = #tpu.pipeline_mode<synchronous>, transform_indices = @transform_4, window_bounds = array<i64: 128, 512>}, {pipeline_mode = #tpu.pipeline_mode<synchronous>, transform_indices = @transform_5, window_bounds = array<i64: 1, 512>}, {pipeline_mode = #tpu.pipeline_mode<synchronous>, transform_indices = @transform_6, window_bounds = array<i64: 128, 128>}, {pipeline_mode = #tpu.pipeline_mode<synchronous>, transform_indices = @transform_7, window_bounds = array<i64: 1, 128>}, {transform_indices = @transform_8, window_bounds = array<i64: 32, 128>}, {pipeline_mode = #tpu.pipeline_mode<synchronous>, transform_indices = @transform_9, window_bounds = array<i64: 8, 128>}, {pipeline_mode = #tpu.pipeline_mode<synchronous>, transform_indices = @transform_10, window_bounds = array<i64: 8, 128>}]} {
    %c0_i32 = arith.constant 0 : i32
    %0 = arith.cmpi eq, %arg0, %c0_i32 : i32
    %1 = arith.extui %0 : i1 to i32
    %c0_i32_0 = arith.constant 0 : i32
    %2 = arith.cmpi ne, %1, %c0_i32_0 : i32
    scf.if %2 {
      %c0_49 = arith.constant 0 : index
      %c0_50 = arith.constant 0 : index
      %129 = vector.load %arg2[%c0_49, %c0_50] : memref<8x128xf32, #tpu.memory_space<vmem>>, vector<8x128xf32>
      %c0_51 = arith.constant 0 : index
      %c0_52 = arith.constant 0 : index
      %130 = vector.load %arg10[%c0_51, %c0_52] : memref<8x128xf32, #tpu.memory_space<vmem>>, vector<8x128xf32>
      tpu.vector_store %arg10[%c0_51, %c0_52], %129 {strides = array<i32>} : memref<8x128xf32, #tpu.memory_space<vmem>>, vector<8x128xf32>,
      %c0_53 = arith.constant 0 : index
      %c0_54 = arith.constant 0 : index
      %131 = vector.load %arg3[%c0_53, %c0_54] : memref<8x128xf32, #tpu.memory_space<vmem>>, vector<8x128xf32>
      %c0_55 = arith.constant 0 : index
      %c0_56 = arith.constant 0 : index
      %132 = vector.load %arg11[%c0_55, %c0_56] : memref<8x128xf32, #tpu.memory_space<vmem>>, vector<8x128xf32>
      tpu.vector_store %arg11[%c0_55, %c0_56], %131 {strides = array<i32>} : memref<8x128xf32, #tpu.memory_space<vmem>>, vector<8x128xf32>,
    } else {
    }
    %c0 = arith.constant 0 : index
    %c0_1 = arith.constant 0 : index
    %3 = vector.load %arg1[%c0, %c0_1] : memref<32x128xf32, #tpu.memory_space<vmem>>, vector<32x128xf32>
    %c0_2 = arith.constant 0 : index
    %c0_3 = arith.constant 0 : index
    %4 = vector.load %arg4[%c0_2, %c0_3] : memref<128x512xf32, #tpu.memory_space<vmem>>, vector<128x512xf32>
    %cst = arith.constant dense<0.000000e+00> : vector<32x512xf32>
    %5 = tpu.matmul %3, %4, %cst {dimension_numbers = #tpu.dot_dimension_numbers<[1], [0], [0], [1], [0, 0, 1, 1], [], []>} : vector<32x128xf32>, vector<128x512xf32>, vector<32x512xf32> -> vector<32x512xf32>
    %c0_4 = arith.constant 0 : index
    %c0_5 = arith.constant 0 : index
    %6 = vector.load %arg6[%c0_4, %c0_5] : memref<1x512xf32, #tpu.memory_space<vmem>>, vector<1x512xf32>
    %7 = vector.broadcast %6 : vector<1x512xf32> to vector<32x512xf32>
    %8 = arith.addf %5, %7 : vector<32x512xf32>
    %c0_6 = arith.constant 0 : index
    %c0_7 = arith.constant 0 : index
    %9 = vector.load %arg12[%c0_6, %c0_7] : memref<32x512xf32, #tpu.memory_space<vmem>>, vector<32x512xf32>
    tpu.vector_store %arg12[%c0_6, %c0_7], %8 {strides = array<i32>} : memref<32x512xf32, #tpu.memory_space<vmem>>, vector<32x512xf32>,
    %c0_8 = arith.constant 0 : index
    %c0_9 = arith.constant 0 : index
    %10 = vector.load %arg5[%c0_8, %c0_9] : memref<128x512xf32, #tpu.memory_space<vmem>>, vector<128x512xf32>
    %c0_10 = arith.constant 0 : index
    %c0_11 = arith.constant 0 : index
    %11 = vector.load %arg10[%c0_10, %c0_11] : memref<8x128xf32, #tpu.memory_space<vmem>>, vector<8x128xf32>
    %c0_12 = arith.constant 0 : index
    %c0_13 = arith.constant 0 : index
    %12 = vector.load %arg11[%c0_12, %c0_13] : memref<8x128xf32, #tpu.memory_space<vmem>>, vector<8x128xf32>
    %c0_i32_14 = arith.constant 0 : i32
    %c8_i32 = arith.constant 8 : i32
    %13 = arith.muli %c0_i32_14, %c8_i32 : i32
    %14 = tpu.assume_multiple %13, 8 : i32
    %15 = arith.index_cast %14 : i32 to index
    %c0_15 = arith.constant 0 : index
    %16 = vector.load %arg12[%15, %c0_15] : memref<32x512xf32, #tpu.memory_space<vmem>>, vector<8x512xf32>
    %cst_16 = arith.constant dense<0.000000e+00> : vector<8x512xf32>
    %17 = tpu.matmul %11, %10, %cst_16 {dimension_numbers = #tpu.dot_dimension_numbers<[1], [0], [0], [1], [0, 0, 1, 1], [], []>} : vector<8x128xf32>, vector<128x512xf32>, vector<8x512xf32> -> vector<8x512xf32>
    %18 = arith.addf %16, %17 : vector<8x512xf32>
    %19 = vector.extract_strided_slice %18 {offsets = [0, 0], sizes = [8, 384], strides = [1, 1]} : vector<8x512xf32> to vector<8x384xf32>
    %20 = arith.negf %19 : vector<8x384xf32>
    %21 = math.exp %20 : vector<8x384xf32>
    %cst_17 = arith.constant 1.000000e+00 : f32
    %22 = vector.broadcast %cst_17 : f32 to vector<8x384xf32>
    %23 = arith.addf %22, %21 : vector<8x384xf32>
    %24 = arith.divf %22, %23 : vector<8x384xf32>
    %25 = vector.extract_strided_slice %24 {offsets = [0, 0], sizes = [8, 128], strides = [1, 1]} : vector<8x384xf32> to vector<8x128xf32>
    %26 = vector.extract_strided_slice %24 {offsets = [0, 128], sizes = [8, 128], strides = [1, 1]} : vector<8x384xf32> to vector<8x128xf32>
    %27 = vector.extract_strided_slice %24 {offsets = [0, 256], sizes = [8, 128], strides = [1, 1]} : vector<8x384xf32> to vector<8x128xf32>
    %28 = vector.extract_strided_slice %18 {offsets = [0, 384], sizes = [8, 128], strides = [1, 1]} : vector<8x512xf32> to vector<8x128xf32>
    %29 = math.tanh %28 : vector<8x128xf32>
    %30 = arith.mulf %26, %12 : vector<8x128xf32>
    %31 = arith.mulf %25, %29 : vector<8x128xf32>
    %32 = arith.addf %30, %31 : vector<8x128xf32>
    %33 = math.tanh %32 : vector<8x128xf32>
    %34 = arith.mulf %27, %33 : vector<8x128xf32>
    %35 = arith.index_cast %14 : i32 to index
    %c0_18 = arith.constant 0 : index
    %36 = vector.load %arg13[%35, %c0_18] : memref<32x128xf32, #tpu.memory_space<vmem>>, vector<8x128xf32>
    tpu.vector_store %arg13[%35, %c0_18], %34 {strides = array<i32>} : memref<32x128xf32, #tpu.memory_space<vmem>>, vector<8x128xf32>,
    %c1_i32 = arith.constant 1 : i32
    %c8_i32_19 = arith.constant 8 : i32
    %37 = arith.muli %c1_i32, %c8_i32_19 : i32
    %38 = tpu.assume_multiple %37, 8 : i32
    %39 = arith.index_cast %38 : i32 to index
    %c0_20 = arith.constant 0 : index
    %40 = vector.load %arg12[%39, %c0_20] : memref<32x512xf32, #tpu.memory_space<vmem>>, vector<8x512xf32>
    %cst_21 = arith.constant dense<0.000000e+00> : vector<8x512xf32>
    %41 = tpu.matmul %34, %10, %cst_21 {dimension_numbers = #tpu.dot_dimension_numbers<[1], [0], [0], [1], [0, 0, 1, 1], [], []>} : vector<8x128xf32>, vector<128x512xf32>, vector<8x512xf32> -> vector<8x512xf32>
    %42 = arith.addf %40, %41 : vector<8x512xf32>
    %43 = vector.extract_strided_slice %42 {offsets = [0, 0], sizes = [8, 384], strides = [1, 1]} : vector<8x512xf32> to vector<8x384xf32>
    %44 = arith.negf %43 : vector<8x384xf32>
    %45 = math.exp %44 : vector<8x384xf32>
    %cst_22 = arith.constant 1.000000e+00 : f32
    %46 = vector.broadcast %cst_22 : f32 to vector<8x384xf32>
    %47 = arith.addf %46, %45 : vector<8x384xf32>
    %48 = arith.divf %46, %47 : vector<8x384xf32>
    %49 = vector.extract_strided_slice %48 {offsets = [0, 0], sizes = [8, 128], strides = [1, 1]} : vector<8x384xf32> to vector<8x128xf32>
    %50 = vector.extract_strided_slice %48 {offsets = [0, 128], sizes = [8, 128], strides = [1, 1]} : vector<8x384xf32> to vector<8x128xf32>
    %51 = vector.extract_strided_slice %48 {offsets = [0, 256], sizes = [8, 128], strides = [1, 1]} : vector<8x384xf32> to vector<8x128xf32>
    %52 = vector.extract_strided_slice %42 {offsets = [0, 384], sizes = [8, 128], strides = [1, 1]} : vector<8x512xf32> to vector<8x128xf32>
    %53 = math.tanh %52 : vector<8x128xf32>
    %54 = arith.mulf %50, %32 : vector<8x128xf32>
    %55 = arith.mulf %49, %53 : vector<8x128xf32>
    %56 = arith.addf %54, %55 : vector<8x128xf32>
    %57 = math.tanh %56 : vector<8x128xf32>
    %58 = arith.mulf %51, %57 : vector<8x128xf32>
    %59 = arith.index_cast %38 : i32 to index
    %c0_23 = arith.constant 0 : index
    %60 = vector.load %arg13[%59, %c0_23] : memref<32x128xf32, #tpu.memory_space<vmem>>, vector<8x128xf32>
    tpu.vector_store %arg13[%59, %c0_23], %58 {strides = array<i32>} : memref<32x128xf32, #tpu.memory_space<vmem>>, vector<8x128xf32>,
    %c2_i32 = arith.constant 2 : i32
    %c8_i32_24 = arith.constant 8 : i32
    %61 = arith.muli %c2_i32, %c8_i32_24 : i32
    %62 = tpu.assume_multiple %61, 8 : i32
    %63 = arith.index_cast %62 : i32 to index
    %c0_25 = arith.constant 0 : index
    %64 = vector.load %arg12[%63, %c0_25] : memref<32x512xf32, #tpu.memory_space<vmem>>, vector<8x512xf32>
    %cst_26 = arith.constant dense<0.000000e+00> : vector<8x512xf32>
    %65 = tpu.matmul %58, %10, %cst_26 {dimension_numbers = #tpu.dot_dimension_numbers<[1], [0], [0], [1], [0, 0, 1, 1], [], []>} : vector<8x128xf32>, vector<128x512xf32>, vector<8x512xf32> -> vector<8x512xf32>
    %66 = arith.addf %64, %65 : vector<8x512xf32>
    %67 = vector.extract_strided_slice %66 {offsets = [0, 0], sizes = [8, 384], strides = [1, 1]} : vector<8x512xf32> to vector<8x384xf32>
    %68 = arith.negf %67 : vector<8x384xf32>
    %69 = math.exp %68 : vector<8x384xf32>
    %cst_27 = arith.constant 1.000000e+00 : f32
    %70 = vector.broadcast %cst_27 : f32 to vector<8x384xf32>
    %71 = arith.addf %70, %69 : vector<8x384xf32>
    %72 = arith.divf %70, %71 : vector<8x384xf32>
    %73 = vector.extract_strided_slice %72 {offsets = [0, 0], sizes = [8, 128], strides = [1, 1]} : vector<8x384xf32> to vector<8x128xf32>
    %74 = vector.extract_strided_slice %72 {offsets = [0, 128], sizes = [8, 128], strides = [1, 1]} : vector<8x384xf32> to vector<8x128xf32>
    %75 = vector.extract_strided_slice %72 {offsets = [0, 256], sizes = [8, 128], strides = [1, 1]} : vector<8x384xf32> to vector<8x128xf32>
    %76 = vector.extract_strided_slice %66 {offsets = [0, 384], sizes = [8, 128], strides = [1, 1]} : vector<8x512xf32> to vector<8x128xf32>
    %77 = math.tanh %76 : vector<8x128xf32>
    %78 = arith.mulf %74, %56 : vector<8x128xf32>
    %79 = arith.mulf %73, %77 : vector<8x128xf32>
    %80 = arith.addf %78, %79 : vector<8x128xf32>
    %81 = math.tanh %80 : vector<8x128xf32>
    %82 = arith.mulf %75, %81 : vector<8x128xf32>
    %83 = arith.index_cast %62 : i32 to index
    %c0_28 = arith.constant 0 : index
    %84 = vector.load %arg13[%83, %c0_28] : memref<32x128xf32, #tpu.memory_space<vmem>>, vector<8x128xf32>
    tpu.vector_store %arg13[%83, %c0_28], %82 {strides = array<i32>} : memref<32x128xf32, #tpu.memory_space<vmem>>, vector<8x128xf32>,
    %c3_i32 = arith.constant 3 : i32
    %c8_i32_29 = arith.constant 8 : i32
    %85 = arith.muli %c3_i32, %c8_i32_29 : i32
    %86 = tpu.assume_multiple %85, 8 : i32
    %87 = arith.index_cast %86 : i32 to index
    %c0_30 = arith.constant 0 : index
    %88 = vector.load %arg12[%87, %c0_30] : memref<32x512xf32, #tpu.memory_space<vmem>>, vector<8x512xf32>
    %cst_31 = arith.constant dense<0.000000e+00> : vector<8x512xf32>
    %89 = tpu.matmul %82, %10, %cst_31 {dimension_numbers = #tpu.dot_dimension_numbers<[1], [0], [0], [1], [0, 0, 1, 1], [], []>} : vector<8x128xf32>, vector<128x512xf32>, vector<8x512xf32> -> vector<8x512xf32>
    %90 = arith.addf %88, %89 : vector<8x512xf32>
    %91 = vector.extract_strided_slice %90 {offsets = [0, 0], sizes = [8, 384], strides = [1, 1]} : vector<8x512xf32> to vector<8x384xf32>
    %92 = arith.negf %91 : vector<8x384xf32>
    %93 = math.exp %92 : vector<8x384xf32>
    %cst_32 = arith.constant 1.000000e+00 : f32
    %94 = vector.broadcast %cst_32 : f32 to vector<8x384xf32>
    %95 = arith.addf %94, %93 : vector<8x384xf32>
    %96 = arith.divf %94, %95 : vector<8x384xf32>
    %97 = vector.extract_strided_slice %96 {offsets = [0, 0], sizes = [8, 128], strides = [1, 1]} : vector<8x384xf32> to vector<8x128xf32>
    %98 = vector.extract_strided_slice %96 {offsets = [0, 128], sizes = [8, 128], strides = [1, 1]} : vector<8x384xf32> to vector<8x128xf32>
    %99 = vector.extract_strided_slice %96 {offsets = [0, 256], sizes = [8, 128], strides = [1, 1]} : vector<8x384xf32> to vector<8x128xf32>
    %100 = vector.extract_strided_slice %90 {offsets = [0, 384], sizes = [8, 128], strides = [1, 1]} : vector<8x512xf32> to vector<8x128xf32>
    %101 = math.tanh %100 : vector<8x128xf32>
    %102 = arith.mulf %98, %80 : vector<8x128xf32>
    %103 = arith.mulf %97, %101 : vector<8x128xf32>
    %104 = arith.addf %102, %103 : vector<8x128xf32>
    %105 = math.tanh %104 : vector<8x128xf32>
    %106 = arith.mulf %99, %105 : vector<8x128xf32>
    %107 = arith.index_cast %86 : i32 to index
    %c0_33 = arith.constant 0 : index
    %108 = vector.load %arg13[%107, %c0_33] : memref<32x128xf32, #tpu.memory_space<vmem>>, vector<8x128xf32>
    tpu.vector_store %arg13[%107, %c0_33], %106 {strides = array<i32>} : memref<32x128xf32, #tpu.memory_space<vmem>>, vector<8x128xf32>,
    %c4_i32 = arith.constant 4 : i32
    %c0_34 = arith.constant 0 : index
    %c0_35 = arith.constant 0 : index
    %109 = vector.load %arg10[%c0_34, %c0_35] : memref<8x128xf32, #tpu.memory_space<vmem>>, vector<8x128xf32>
    tpu.vector_store %arg10[%c0_34, %c0_35], %106 {strides = array<i32>} : memref<8x128xf32, #tpu.memory_space<vmem>>, vector<8x128xf32>,
    %c0_36 = arith.constant 0 : index
    %c0_37 = arith.constant 0 : index
    %110 = vector.load %arg11[%c0_36, %c0_37] : memref<8x128xf32, #tpu.memory_space<vmem>>, vector<8x128xf32>
    tpu.vector_store %arg11[%c0_36, %c0_37], %104 {strides = array<i32>} : memref<8x128xf32, #tpu.memory_space<vmem>>, vector<8x128xf32>,
    %c0_38 = arith.constant 0 : index
    %c0_39 = arith.constant 0 : index
    %111 = vector.load %arg13[%c0_38, %c0_39] : memref<32x128xf32, #tpu.memory_space<vmem>>, vector<32x128xf32>
    %c0_40 = arith.constant 0 : index
    %c0_41 = arith.constant 0 : index
    %112 = vector.load %arg7[%c0_40, %c0_41] : memref<128x128xf32, #tpu.memory_space<vmem>>, vector<128x128xf32>
    %cst_42 = arith.constant dense<0.000000e+00> : vector<32x128xf32>
    %113 = tpu.matmul %111, %112, %cst_42 {dimension_numbers = #tpu.dot_dimension_numbers<[1], [0], [0], [1], [0, 0, 1, 1], [], []>} : vector<32x128xf32>, vector<128x128xf32>, vector<32x128xf32> -> vector<32x128xf32>
    %c0_43 = arith.constant 0 : index
    %c0_44 = arith.constant 0 : index
    %114 = vector.load %arg8[%c0_43, %c0_44] : memref<1x128xf32, #tpu.memory_space<vmem>>, vector<1x128xf32>
    %115 = vector.broadcast %114 : vector<1x128xf32> to vector<32x128xf32>
    %116 = arith.addf %113, %115 : vector<32x128xf32>
    %cst_45 = arith.constant dense<0xFF800000> : vector<32xf32>
    %117 = vector.multi_reduction <maximumf>, %116, %cst_45 [1] : vector<32x128xf32> to vector<32xf32>
    %118 = vector.shape_cast %117 : vector<32xf32> to vector<32x1xf32>
    %119 = vector.broadcast %118 : vector<32x1xf32> to vector<32x128xf32>
    %120 = arith.subf %116, %119 : vector<32x128xf32>
    %121 = math.exp %120 : vector<32x128xf32>
    %cst_46 = arith.constant dense<0.000000e+00> : vector<32xf32>
    %122 = vector.multi_reduction <add>, %121, %cst_46 [1] : vector<32x128xf32> to vector<32xf32>
    %123 = vector.shape_cast %122 : vector<32xf32> to vector<32x1xf32>
    %124 = math.log %123 : vector<32x1xf32>
    %125 = arith.addf %118, %124 : vector<32x1xf32>
    %126 = vector.broadcast %125 : vector<32x1xf32> to vector<32x128xf32>
    %127 = arith.subf %116, %126 : vector<32x128xf32>
    %c0_47 = arith.constant 0 : index
    %c0_48 = arith.constant 0 : index
    %128 = vector.load %arg9[%c0_47, %c0_48] : memref<32x128xf32, #tpu.memory_space<vmem>>, vector<32x128xf32>
    tpu.vector_store %arg9[%c0_47, %c0_48], %127 {strides = array<i32>} : memref<32x128xf32, #tpu.memory_space<vmem>>, vector<32x128xf32>,
    return
  }
  func.func @transform_0(%arg0: i32) -> (i32, i32) {
    %c0_i32 = arith.constant 0 : i32
    %c0_i32_0 = arith.constant 0 : i32
    return %arg0, %c0_i32 : i32, i32
  }
  func.func @transform_1(%arg0: i32) -> (i32, i32) {
    %c0_i32 = arith.constant 0 : i32
    %c0_i32_0 = arith.constant 0 : i32
    %c0_i32_1 = arith.constant 0 : i32
    return %c0_i32, %c0_i32_0 : i32, i32
  }
  func.func @transform_2(%arg0: i32) -> (i32, i32) {
    %c0_i32 = arith.constant 0 : i32
    %c0_i32_0 = arith.constant 0 : i32
    %c0_i32_1 = arith.constant 0 : i32
    return %c0_i32, %c0_i32_0 : i32, i32
  }
  func.func @transform_3(%arg0: i32) -> (i32, i32) {
    %c0_i32 = arith.constant 0 : i32
    %c0_i32_0 = arith.constant 0 : i32
    %c0_i32_1 = arith.constant 0 : i32
    return %c0_i32, %c0_i32_0 : i32, i32
  }
  func.func @transform_4(%arg0: i32) -> (i32, i32) {
    %c0_i32 = arith.constant 0 : i32
    %c0_i32_0 = arith.constant 0 : i32
    %c0_i32_1 = arith.constant 0 : i32
    return %c0_i32, %c0_i32_0 : i32, i32
  }
  func.func @transform_5(%arg0: i32) -> (i32, i32) {
    %c0_i32 = arith.constant 0 : i32
    %c0_i32_0 = arith.constant 0 : i32
    %c0_i32_1 = arith.constant 0 : i32
    return %c0_i32, %c0_i32_0 : i32, i32
  }
  func.func @transform_6(%arg0: i32) -> (i32, i32) {
    %c0_i32 = arith.constant 0 : i32
    %c0_i32_0 = arith.constant 0 : i32
    %c0_i32_1 = arith.constant 0 : i32
    return %c0_i32, %c0_i32_0 : i32, i32
  }
  func.func @transform_7(%arg0: i32) -> (i32, i32) {
    %c0_i32 = arith.constant 0 : i32
    %c0_i32_0 = arith.constant 0 : i32
    %c0_i32_1 = arith.constant 0 : i32
    return %c0_i32, %c0_i32_0 : i32, i32
  }
  func.func @transform_8(%arg0: i32) -> (i32, i32) {
    %c0_i32 = arith.constant 0 : i32
    %c0_i32_0 = arith.constant 0 : i32
    return %arg0, %c0_i32 : i32, i32
  }
  func.func @transform_9(%arg0: i32) -> (i32, i32) {
    %c0_i32 = arith.constant 0 : i32
    %c0_i32_0 = arith.constant 0 : i32
    %c0_i32_1 = arith.constant 0 : i32
    return %c0_i32, %c0_i32_0 : i32, i32
  }
  func.func @transform_10(%arg0: i32) -> (i32, i32) {
    %c0_i32 = arith.constant 0 : i32
    %c0_i32_0 = arith.constant 0 : i32
    %c0_i32_1 = arith.constant 0 : i32
    return %c0_i32, %c0_i32_0 : i32, i32
  }
}

</mosaic_0001>

<bundles_post_ra>
// kernel: tpu_custom_call.1
= control target key start
LH: loop header
LB: loop body
LE: loop exit
PB: predicated region body
PF: predicated region fallthrough
CT: control target
= control target key end

     0   :  { %s2994_s0 = inlined_call_operand.hbm [shape: f32[64,128], index: 0, kind: input, shape index: {}]   ;;  %s2995_s1 = inlined_call_operand.hbm [shape: f32[8,128], index: 1, kind: input, shape index: {}]   ;;  %s2996_s2 = inlined_call_operand.hbm [shape: f32[8,128], index: 2, kind: input, shape index: {}]   ;;  %s2997_s3 = inlined_call_operand.hbm [shape: f32[128,512], index: 3, kind: input, shape index: {}]   ;;  %s2998_s4 = inlined_call_operand.hbm [shape: f32[128,512], index: 4, kind: input, shape index: {}]   ;;  %s2999_s5 = inlined_call_operand.vmem [shape: f32[1,512], index: 5, kind: input, shape index: {}]   ;;  %s3000_s6 = inlined_call_operand.hbm [shape: f32[128,128], index: 6, kind: input, shape index: {}]   ;;  %s3001_s7 = inlined_call_operand.vmem [shape: f32[1,128], index: 7, kind: input, shape index: {}]   ;;  %s3002_s8 = inlined_call_operand.hbm [shape: f32[64,128], index: 8, kind: output, shape index: {0}]   ;;  %s3003_s9 = inlined_call_operand.hbm [shape: f32[8,128], index: 9, kind: output, shape index: {1}]   ;;  %s3004_s10 = inlined_call_operand.hbm [shape: f32[8,128], index: 10, kind: output, shape index: {2}]  }
   0x1   :  { %3032 = sst [smem:[#allocation61_spill]] %s2995_s1 }
   0x2   :  { %3033 = sst [smem:[#allocation62_spill]] %s2996_s2 }
   0x3   :  { %3034 = sst [smem:[#allocation63_spill]] %s2997_s3 }
   0x4   :  { %3035 = sst [smem:[#allocation64_spill]] %s2998_s4 }
   0x5   :  { %16 = vsyncpa [#allocation5], 0 }
   0x6   :  { %18 = vsyncpa [#allocation5 + $0x1], 0 }
   0x7   :  { %19 = vsyncpa [#allocation8], 0 }
   0x8   :  { %20 = vsyncpa [#allocation11], 0 }
   0x9   :  { %21 = vsyncpa [#allocation14], 0 }
   0xa   :  { %22 = vsyncpa [#allocation6], 0 }
   0xb   :  { %24 = vsyncpa [#allocation6 + $0x1], 0 }
   0xc   :  { %25 = vsyncpa [#allocation17], 0  ;;  %s2285_s13 = smov 0   ;;  %s2287_s14 = smov 0  }
   0xd   :  { %s2289_s15 = smov 0   ;;  %s2291_s16 = smov 0  }
   0xe LB: > { %s3036_s1 = sld [smem:[#allocation61_spill]]  ;;  %s2309_s20 = sadd.s32 4294967295, %s2215_s16   ;;  %s2215_s16 = sphi %s2291_s16, %s3129_s16   ;;  %s2211_s15 = sphi %s2289_s15, %s3128_s15   ;;  %s2207_s14 = sphi %s2287_s14, %s3127_s14   ;;  %s2203_s13 = sphi %s2285_s13, %s3126_s13  }
   0xf   : > { %p1655_p0 = scmp.ge.s32.totalorder %s2215_s16, 1  ;;  %p52_p1 = scmp.eq.s32.totalorder %s2309_s20, 0 }
  0x10   : > { %p277_p2 = scmp.lt.s32.totalorder %s2215_s16, 3  ;;  %s2217_s22 = smov [#allocation7]  }
  0x11   : > { %s291_s23 = sshll.u32 %s2217_s22, 4  ;;  %s3038_s3 = sld [smem:[#allocation63_spill]]  ;;  %s292_s23 = int_to_ptr.vmem [resolvable:$true] %s291_s23 }
  0x12   : > { %p2315_p4 = pnand %p1655_p0, %p277_p2  ;;  %s2218_s28 = smov [#allocation10]  }
  0x13   : > { %s314_s29 = sshll.u32 %s2218_s28, 4  ;;  %s2219_s30 = smov 512   ;;  %s315_s29 = int_to_ptr.vmem [resolvable:$true] %s314_s29 }
  0x14   : > { %s289_s19 = sshll.u32 %s3036_s1, 4  ;;  %p1729_p6 = pneg %p2315_p4  ;;  %s290_s19 = int_to_ptr.hbm [resolvable:$true] %s289_s19 }
  0x15   : > { %s2220_s11 = smov 32   ;;  %s3040_s2 = sld [smem:[#allocation62_spill]] }
  0x16   : > { %p2327_p7 = pnand %p1729_p6, %p52_p1  ;;  %s2221_s22 = smov [#allocation9]  }
  0x17   : > { %s312_s26 = sshll.u32 %s3038_s3, 4  ;;  %s303_s24 = sshll.u32 %s2221_s22, 4  ;;  %s313_s26 = int_to_ptr.hbm [resolvable:$true] %s312_s26  ;;  %s304_s24 = int_to_ptr.vmem [resolvable:$true] %s303_s24 }
  0x18   : > { %1732 = dma.hbm_to_vmem [thread:$0]  (!%p2327_p7), %s290_s19, 128, %s292_s23, [#allocation8]  }
  0x19   : > { %1738 = dma.hbm_to_vmem [thread:$0]  (!%p2327_p7), %s313_s26, 8192, %s315_s29, [#allocation11], %s2219_s30, %s2219_s30, %s2220_s11  }
  0x1a   : > { %s3041_s4 = sld [smem:[#allocation64_spill]]  ;;  %s2222_s19 = smov [#allocation12]  }
  0x1b   : > { %s301_s18 = sshll.u32 %s3040_s2, 4  ;;  %s328_s23 = sshll.u32 %s2222_s19, 4  ;;  %s302_s18 = int_to_ptr.hbm [resolvable:$true] %s301_s18  ;;  %s329_s23 = int_to_ptr.vmem [resolvable:$true] %s328_s23 }
  0x1c   : > { %1735 = dma.hbm_to_vmem [thread:$0]  (!%p2327_p7), %s302_s18, 128, %s304_s24, [#allocation8]  }
  0x1d   : > { %s343_s12 = sshll.u32 %s3000_s6, 4  ;;  %s2223_s1 = smov [#allocation13]   ;;  %s344_s12 = int_to_ptr.hbm [resolvable:$true] %s343_s12 }
  0x1e   : > { %s345_s17 = sshll.u32 %s2223_s1, 4  ;;  %s3005_s18 = smov 128   ;;  %s346_s17 = int_to_ptr.vmem [resolvable:$true] %s345_s17 }
  0x1f   : > { %s3006_s22 = smov 8   ;;  %s1654_s24 = sadd.s32 4294967294, %s2215_s16  }
  0x20   : > { %s326_s28 = sshll.u32 %s3041_s4, 4  ;;  %s2355_s25 = sadd.s32 1, %s2215_s16   ;;  %s327_s28 = int_to_ptr.hbm [resolvable:$true] %s326_s28 }
  0x21   : > { %1741 = dma.hbm_to_vmem [thread:$0]  (!%p2327_p7), %s327_s28, 8192, %s329_s23, [#allocation11], %s2219_s30, %s2219_s30, %s2220_s11  }
  0x22   : > { %1744 = dma.hbm_to_vmem [thread:$0]  (!%p2327_p7), %s344_s12, 2048, %s346_s17, [#allocation14], %s3005_s18, %s3005_s18, %s3006_s22  }
  0x23   : > { %s38_s30 = sadd.s32 1, %s2211_s15  ;;  %s35_s11 = ssub.s32 %s2215_s16, %s2355_s25 }
  0x24   : > { %p45_p8 = scmp.ne.s32.totalorder %s2211_s15, %s2207_s14  ;;  %p36_p9 = scmp.eq.s32.totalorder %s35_s11, 0 }
  0x25   : > { %p46_p10 = scmp.eq.s32.totalorder %s2215_s16, 0  ;;  %p51_p11 = scmp.ne.s32.totalorder %s2207_s14, %s2203_s13 }
  0x26   : > { %p3007_p12 = scmp.eq.s32.totalorder %s2309_s20, 1  ;;  %p228_p2 = scmp.eq.s32.totalorder %s1654_s24, 1 }
  0x27   : > { %s2367_s28 = scalar_select %p36_p9, %s2211_s15, %s38_s30  }
  0x28   : > { %p2371_p13 = por %p52_p1, %p51_p11  ;;  %p2377_p0 = por %p3007_p12, %p45_p8 }
  0x29   : > { %p47_p6 = por %p46_p10, %p45_p8  ;;  %s362_s23 = sand.u32 1, %s2211_s15  }
  0x2a   : > { %p2382_p7 = por %p228_p2, %p51_p11  ;;  %p1758_p5 = scmp.lt.s32.totalorder %s2215_s16, 2 }
  0x2b   : > { %s1662_s29 = sshll.u32 %s362_s23, 5  ;;  %s1695_s12 = sshll.u32 %s2215_s16, 5 }
  0x2c   : > { %s371_s30 = scalar_lea.hbm %s2994_s0, %s1695_s12  ;;  %s366_s18 = scalar_lea.vmem [#allocation4], %s1662_s29 }
  0x2d   : > { %s372_s11 = sshll.u32 %s371_s30, 4  ;;  %s374_s22 = sshll.u32 %s366_s18, 4  ;;  %s373_s11 = int_to_ptr.hbm [resolvable:$true] %s372_s11  ;;  %s375_s22 = int_to_ptr.vmem [resolvable:$true] %s374_s22 }
  0x2e   : > { %p2391_p9 = pnand %p1758_p5, %p47_p6  ;;  %s363_s2 = scalar_lea.sflag [#allocation5], %s362_s23 }
  0x2f   : > { %s2047_s3 = sshra.s32 %s373_s11, 4  ;;  %s2054_s18 = scalar_lea.hbm %s2994_s0, 64  ;;  %s2048_s3 = int_to_ptr.hbm [resolvable:$true] %s2047_s3 }
  0x30   : > { %s2049_s4 = scalar_lea.hbm %s2048_s3, 32  ;;  %p2051_p10 = pneg %p2391_p9 }
  0x31   : > { %p2050_p8 = scmp.ne.s32.totalorder %s2048_s3, %s2049_s4  ;;  %p2055_p5 = scmp.lt.s32.totalorder %s2048_s3, %s2994_s0 }
  0x32   : > { %p2056_p6 = scmp.lt.s32.totalorder %s2054_s18, %s2049_s4 }
  0x33   : > { %p2052_p11 = pnand %p2051_p10, %p2050_p8 }
  0x34   : > { %p2057_p12 = por %p2056_p6, %p2055_p5 }
  0x35   : > { %p2053_p2 = pneg %p2052_p11 }
  0x37   : > { %p2058_p3 = pnand %p2057_p12, %p2053_p2 }
  0x39   : > { %2061 = shalt.err (!%p2058_p3)
}
  0x3a   : > { %s3046_s23 = smov 8   ;;  %s3047_s30 = smov 128  }
  0x3b   : > { %1748 = dma.hbm_to_vmem [thread:$0]  (!%p2391_p9), %s373_s11, 512, %s375_s22, %s363_s2, %s3047_s30, %s3047_s30, %s3046_s23  }
  0x3c   : > { %386 = sbr.rel (%p2315_p4) target bundleno = 1257 (0x4e9), region = 52 }
  0x41   : > { %s2411_s12 = sand.u32 1, %s2207_s14  }
  0x42   : > { %s1666_s3 = sshll.u32 %s2411_s12, 5  ;;  %s389_s4 = scalar_lea.sflag [#allocation5], %s2411_s12 }
  0x43   : > { %s2415_s1 = scalar_lea.vmem [#allocation4], %s1666_s3 }
  0x44   : > { %2178 = dma.done.wait (%p2371_p13), %s389_s4, 512  }
  0x45   : > { %2180 = vsyncadd (%p2371_p13), %s389_s4, 4294966784 }
  0x46   : > { %2182 = dma.done.wait (%p52_p1), [#allocation8], 256  }
  0x47   : > { %2184 = vsyncadd (%p52_p1), [#allocation8], 4294967040 }
  0x48   : > { %2186 = dma.done.wait (%p52_p1), [#allocation11], 16384  }
  0x49   : > { %2188 = vsyncadd (%p52_p1), [#allocation11], 4294950912 }
  0x4a   : > { %2190 = dma.done.wait (%p52_p1), [#allocation14], 2048  }
  0x4b   : > { %2192 = vsyncadd (%p52_p1), [#allocation14], 4294965248  ;;  %s2433_s2 = scalar_lea.vmem [#allocation15], %s1666_s3  ;;  %p3048_p3 = scmp.ne.s32.totalorder %s2309_s20, 0 }
  0x4d   : > { %460 = sbr.rel (%p3048_p3) target bundleno = 85 (0x55), region = 80 }
  0x52   : > { %v461_v0 = vld [vmem:[#allocation7] sm:$0xff]  ;;  %v463_v1 = vld [vmem:[#allocation9] sm:$0xff] }
  0x53   : > { %462 = vst [vmem:[#allocation16] sm:$0xff] %v461_v0 }
  0x54   : > { %464 = vst [vmem:[#allocation18] sm:$0xff] %v463_v1 }
  0x55 PF: > { %v529_v2 = vld [vmem:[#allocation10 + $0x1e0] sm:$0xff]  ;;  %v531_v3 = vld [vmem:[#allocation10 + $0x1f0] sm:$0xff]  ;;  %v532_v4 = vld [vmem:[#allocation10 + $0x1f8] sm:$0xff]  ;;  %s2226_s24 = smov [#allocation16]   ;;  %s1497_s23 = sshll.u32 %s3003_s9, 4  ;;  %s1498_s23 = int_to_ptr.hbm [resolvable:$true] %s1497_s23 }
  0x56   : > { %543 = vmatpush.msra.mxu1 %v529_v2  ;;  %601 = vmatpush.msra.mxu2 %v531_v3  ;;  %v525_v5 = vld [vmem:[#allocation10 + $0x1c0] sm:$0xff]  ;;  %v527_v6 = vld [vmem:[#allocation10 + $0x1d0] sm:$0xff]  ;;  %v528_v7 = vld [vmem:[#allocation10 + $0x1d8] sm:$0xff]  ;;  %s1495_s18 = sshll.u32 %s2226_s24, 4  ;;  %p3121_p1 = scmp.eq.s32.totalorder %s2309_s20, 1  ;;  %s1496_s18 = int_to_ptr.vmem [resolvable:$true] %s1495_s18 }
  0x57   : > { %630 = vmatpush.msra.mxu3 %v532_v4  ;;  %v2437_v8 = vld [vmem:[#allocation12 + $0x1e0] sm:$0xff]  ;;  %v523_v10 = vld [vmem:[#allocation10 + $0x1b0] sm:$0xff]  ;;  %v524_v11 = vld [vmem:[#allocation10 + $0x1b8] sm:$0xff]  ;;  %s1509_s4 = sshll.u32 %s3004_s10, 4  ;;  %s1696_s22 = sshll.u32 %s2309_s20, 5  ;;  %s1510_s4 = int_to_ptr.hbm [resolvable:$true] %s1509_s4 }
  0x58   : > { %v521_v9 = vld [vmem:[#allocation10 + $0x1a0] sm:$0xff]  ;;  %544 = vmatpush.msra.mxu1 %v525_v5  ;;  %602 = vmatpush.msra.mxu2 %v527_v6  ;;  %v519_v14 = vld [vmem:[#allocation10 + $0x190] sm:$0xff]  ;;  %v520_v15 = vld [vmem:[#allocation10 + $0x198] sm:$0xff]  ;;  %p3122_p4 = pmov %p3121_p1  ;;  %s1479_s24 = scalar_lea.hbm %s3002_s8, %s1696_s22 }
  0x59   : > { %v2439_v12 = vld [vmem:[#allocation12 + $0x1c0] sm:$0xff]  ;;  %631 = vmatpush.msra.mxu3 %v528_v7  ;;  %748 = vmatpush.msra.mxu0 %v2437_v8  ;;  %v515_v18 = vld [vmem:[#allocation10 + $0x170] sm:$0xff]  ;;  %v516_v19 = vld [vmem:[#allocation10 + $0x178] sm:$0xff]  ;;  %s1482_s29 = sshll.u32 %s1479_s24, 4  ;;  %s1468_s17 = scalar_lea.sflag [#allocation6], %s2411_s12  ;;  %s1483_s29 = int_to_ptr.hbm [resolvable:$true] %s1482_s29 }
  0x5a   : > { %v517_v13 = vld [vmem:[#allocation10 + $0x180] sm:$0xff]  ;;  %545 = vmatpush.msra.mxu1 %v521_v9  ;;  %603 = vmatpush.msra.mxu2 %v523_v10  ;;  %v511_v22 = vld [vmem:[#allocation10 + $0x150] sm:$0xff]  ;;  %v512_v23 = vld [vmem:[#allocation10 + $0x158] sm:$0xff] }
  0x5b   : > { %v2442_v16 = vld [vmem:[#allocation12 + $0x1a0] sm:$0xff]  ;;  %632 = vmatpush.msra.mxu3 %v524_v11  ;;  %749 = vmatpush.msra.mxu0 %v2439_v12  ;;  %v507_v26 = vld [vmem:[#allocation10 + $0x130] sm:$0xff]  ;;  %v508_v27 = vld [vmem:[#allocation10 + $0x138] sm:$0xff] }
  0x5c   : > { %v513_v17 = vld [vmem:[#allocation10 + $0x160] sm:$0xff]  ;;  %546 = vmatpush.msra.mxu1 %v517_v13  ;;  %604 = vmatpush.msra.mxu2 %v519_v14  ;;  %v503_v30 = vld [vmem:[#allocation10 + $0x110] sm:$0xff]  ;;  %v504_v31 = vld [vmem:[#allocation10 + $0x118] sm:$0xff] }
  0x5d   : > { %v2445_v20 = vld [vmem:[#allocation12 + $0x180] sm:$0xff]  ;;  %633 = vmatpush.msra.mxu3 %v520_v15  ;;  %750 = vmatpush.msra.mxu0 %v2442_v16  ;;  %v499_v34 = vld [vmem:[#allocation10 + $0xf0] sm:$0xff]  ;;  %v500_v35 = vld [vmem:[#allocation10 + $0xf8] sm:$0xff] }
  0x5e   : > { %v509_v21 = vld [vmem:[#allocation10 + $0x140] sm:$0xff]  ;;  %547 = vmatpush.msra.mxu1 %v513_v17  ;;  %605 = vmatpush.msra.mxu2 %v515_v18  ;;  %v495_v38 = vld [vmem:[#allocation10 + $0xd0] sm:$0xff]  ;;  %v496_v39 = vld [vmem:[#allocation10 + $0xd8] sm:$0xff] }
  0x5f   : > { %v2448_v24 = vld [vmem:[#allocation12 + $0x160] sm:$0xff]  ;;  %634 = vmatpush.msra.mxu3 %v516_v19  ;;  %751 = vmatpush.msra.mxu0 %v2445_v20  ;;  %v491_v42 = vld [vmem:[#allocation10 + $0xb0] sm:$0xff]  ;;  %v492_v43 = vld [vmem:[#allocation10 + $0xb8] sm:$0xff] }
  0x60   : > { %v505_v25 = vld [vmem:[#allocation10 + $0x120] sm:$0xff]  ;;  %548 = vmatpush.msra.mxu1 %v509_v21  ;;  %606 = vmatpush.msra.mxu2 %v511_v22  ;;  %v487_v46 = vld [vmem:[#allocation10 + $0x90] sm:$0xff]  ;;  %v488_v47 = vld [vmem:[#allocation10 + $0x98] sm:$0xff] }
  0x61   : > { %v2451_v28 = vld [vmem:[#allocation12 + $0x140] sm:$0xff]  ;;  %635 = vmatpush.msra.mxu3 %v512_v23  ;;  %752 = vmatpush.msra.mxu0 %v2448_v24  ;;  %v483_v50 = vld [vmem:[#allocation10 + $0x70] sm:$0xff]  ;;  %v484_v51 = vld [vmem:[#allocation10 + $0x78] sm:$0xff] }
  0x62   : > { %v501_v29 = vld [vmem:[#allocation10 + $0x100] sm:$0xff]  ;;  %549 = vmatpush.msra.mxu1 %v505_v25  ;;  %607 = vmatpush.msra.mxu2 %v507_v26  ;;  %v479_v54 = vld [vmem:[#allocation10 + $0x50] sm:$0xff]  ;;  %v480_v55 = vld [vmem:[#allocation10 + $0x58] sm:$0xff] }
  0x63   : > { %v2454_v32 = vld [vmem:[#allocation12 + $0x120] sm:$0xff]  ;;  %636 = vmatpush.msra.mxu3 %v508_v27  ;;  %753 = vmatpush.msra.mxu0 %v2451_v28  ;;  %v475_v58 = vld [vmem:[#allocation10 + $0x30] sm:$0xff]  ;;  %v476_v59 = vld [vmem:[#allocation10 + $0x38] sm:$0xff] }
  0x64   : > { %v497_v33 = vld [vmem:[#allocation10 + $0xe0] sm:$0xff]  ;;  %550 = vmatpush.msra.mxu1 %v501_v29  ;;  %608 = vmatpush.msra.mxu2 %v503_v30  ;;  %v471_v62 = vld [vmem:[#allocation10 + $0x10] sm:$0xff]  ;;  %v472_v63 = vld [vmem:[#allocation10 + $0x18] sm:$0xff] }
  0x65   : > { %v2457_v36 = vld [vmem:[#allocation12 + $0x100] sm:$0xff]  ;;  %637 = vmatpush.msra.mxu3 %v504_v31  ;;  %754 = vmatpush.msra.mxu0 %v2454_v32  ;;  %v2482_v1 = vld [vmem:[%s2415_s1] sm:$0xff]  ;;  %v530_v2 = vld [vmem:[#allocation10 + $0x1e8] sm:$0xff] }
  0x66   : > { %v493_v37 = vld [vmem:[#allocation10 + $0xc0] sm:$0xff]  ;;  %551 = vmatpush.msra.mxu1 %v497_v33  ;;  %609 = vmatpush.msra.mxu2 %v499_v34  ;;  %v2487_v4 = vld [vmem:[#allocation12 + $0x1f0] sm:$0xff]  ;;  %v2491_v5 = vld [vmem:[#allocation12 + $0x1f8] sm:$0xff] }
  0x67   : > { %v2460_v40 = vld [vmem:[#allocation12 + $0xe0] sm:$0xff]  ;;  %638 = vmatpush.msra.mxu3 %v500_v35  ;;  %755 = vmatpush.msra.mxu0 %v2457_v36  ;;  %v526_v6 = vld [vmem:[#allocation10 + $0x1c8] sm:$0xff]  ;;  %v2496_v9 = vld [vmem:[#allocation12 + $0x1d0] sm:$0xff] }
  0x68   : > { %v489_v41 = vld [vmem:[#allocation10 + $0xa0] sm:$0xff]  ;;  %552 = vmatpush.msra.mxu1 %v493_v37  ;;  %610 = vmatpush.msra.mxu2 %v495_v38  ;;  %v2500_v10 = vld [vmem:[#allocation12 + $0x1d8] sm:$0xff]  ;;  %v522_v11 = vld [vmem:[#allocation10 + $0x1a8] sm:$0xff] }
  0x69   : > { %v2463_v44 = vld [vmem:[#allocation12 + $0xc0] sm:$0xff]  ;;  %639 = vmatpush.msra.mxu3 %v496_v39  ;;  %756 = vmatpush.msra.mxu0 %v2460_v40  ;;  %v2503_v13 = vld [vmem:[#allocation12 + $0x1b0] sm:$0xff]  ;;  %v2507_v14 = vld [vmem:[#allocation12 + $0x1b8] sm:$0xff] }
  0x6a   : > { %v485_v45 = vld [vmem:[#allocation10 + $0x80] sm:$0xff]  ;;  %553 = vmatpush.msra.mxu1 %v489_v41  ;;  %611 = vmatpush.msra.mxu2 %v491_v42  ;;  %v518_v15 = vld [vmem:[#allocation10 + $0x188] sm:$0xff]  ;;  %v2510_v17 = vld [vmem:[#allocation12 + $0x190] sm:$0xff] }
  0x6b   : > { %v2466_v48 = vld [vmem:[#allocation12 + $0xa0] sm:$0xff]  ;;  %640 = vmatpush.msra.mxu3 %v492_v43  ;;  %757 = vmatpush.msra.mxu0 %v2463_v44  ;;  %v2513_v18 = vld [vmem:[%s2415_s1 + $0x8] sm:$0xff]  ;;  %v514_v21 = vld [vmem:[#allocation10 + $0x168] sm:$0xff] }
  0x6c   : > { %3049 = vst [vmem:[#allocation25_spill] sm:$0xff] %v2466_v48  ;;  %v481_v49 = vld [vmem:[#allocation10 + $0x60] sm:$0xff]  ;;  %554 = vmatpush.msra.mxu1 %v485_v45  ;;  %612 = vmatpush.msra.mxu2 %v487_v46  ;;  %v2516_v19 = vld [vmem:[#allocation12 + $0x198] sm:$0xff]  ;;  %v2522_v22 = vld [vmem:[#allocation12 + $0x170] sm:$0xff] }
  0x6d   : > { %v2469_v52 = vld [vmem:[#allocation12 + $0x80] sm:$0xff]  ;;  %641 = vmatpush.msra.mxu3 %v488_v47  ;;  %758 = vmatpush.msra.mxu0 %v2466_v48  ;;  %v2524_v23 = vld [vmem:[#allocation12 + $0x178] sm:$0xff]  ;;  %v510_v25 = vld [vmem:[#allocation10 + $0x148] sm:$0xff] }
  0x6e   : > { %3050 = vst [vmem:[#allocation26_spill] sm:$0xff] %v2469_v52  ;;  %v477_v53 = vld [vmem:[#allocation10 + $0x40] sm:$0xff]  ;;  %555 = vmatpush.msra.mxu1 %v481_v49  ;;  %613 = vmatpush.msra.mxu2 %v483_v50  ;;  %v2529_v26 = vld [vmem:[#allocation12 + $0x150] sm:$0xff]  ;;  %v2531_v27 = vld [vmem:[#allocation12 + $0x158] sm:$0xff] }
  0x6f   : > { %v2472_v56 = vld [vmem:[#allocation12 + $0x60] sm:$0xff]  ;;  %642 = vmatpush.msra.mxu3 %v484_v51  ;;  %759 = vmatpush.msra.mxu0 %v2469_v52  ;;  %v506_v29 = vld [vmem:[#allocation10 + $0x128] sm:$0xff]  ;;  %v2535_v30 = vld [vmem:[#allocation12 + $0x130] sm:$0xff] }
  0x70   : > { %3051 = vst [vmem:[#allocation27_spill] sm:$0xff] %v2472_v56  ;;  %v473_v57 = vld [vmem:[#allocation10 + $0x20] sm:$0xff]  ;;  %556 = vmatpush.msra.mxu1 %v477_v53  ;;  %614 = vmatpush.msra.mxu2 %v479_v54  ;;  %v2537_v31 = vld [vmem:[#allocation12 + $0x138] sm:$0xff]  ;;  %v502_v33 = vld [vmem:[#allocation10 + $0x108] sm:$0xff] }
  0x71   : > { %v2475_v60 = vld [vmem:[#allocation12 + $0x40] sm:$0xff]  ;;  %643 = vmatpush.msra.mxu3 %v480_v55  ;;  %760 = vmatpush.msra.mxu0 %v2472_v56  ;;  %v2542_v34 = vld [vmem:[#allocation12 + $0x110] sm:$0xff]  ;;  %v2544_v35 = vld [vmem:[#allocation12 + $0x118] sm:$0xff] }
  0x72   : > { %3052 = vst [vmem:[#allocation28_spill] sm:$0xff] %v2475_v60  ;;  %v469_v61 = vld [vmem:[#allocation10] sm:$0xff]  ;;  %557 = vmatpush.msra.mxu1 %v473_v57  ;;  %615 = vmatpush.msra.mxu2 %v475_v58  ;;  %v498_v38 = vld [vmem:[#allocation10 + $0xe8] sm:$0xff]  ;;  %v2555_v39 = vld [vmem:[#allocation12 + $0xf0] sm:$0xff] }
  0x73   : > { %v2478_v0 = vld [vmem:[#allocation12 + $0x20] sm:$0xff]  ;;  %644 = vmatpush.msra.mxu3 %v476_v59  ;;  %761 = vmatpush.msra.mxu0 %v2475_v60  ;;  %v2557_v41 = vld [vmem:[#allocation12 + $0xf8] sm:$0xff]  ;;  %v494_v42 = vld [vmem:[#allocation10 + $0xc8] sm:$0xff] }
  0x74   : > { %3053 = vst [vmem:[#allocation29_spill] sm:$0xff] %v2478_v0  ;;  %558 = vmatpush.msra.mxu1 %v469_v61  ;;  %616 = vmatpush.msra.mxu2 %v471_v62  ;;  %v2485_v3 = vld [vmem:[#allocation12] sm:$0xff]  ;;  %v2562_v43 = vld [vmem:[#allocation12 + $0xd0] sm:$0xff]  ;;  %v2564_v45 = vld [vmem:[#allocation12 + $0xd8] sm:$0xff] }
  0x75   : > { %645 = vmatpush.msra.mxu3 %v472_v63  ;;  %762 = vmatpush.msra.mxu0 %v2478_v0  ;;  %3054 = vst [vmem:[#allocation30_spill] sm:$0xff] %v2485_v3  ;;  %v2494_v7 = vld [vmem:[#allocation16] sm:$0xff]  ;;  %v490_v46 = vld [vmem:[#allocation10 + $0xa8] sm:$0xff]  ;;  %v2568_v47 = vld [vmem:[#allocation12 + $0xb0] sm:$0xff] }
  0x76   : > { %559 = vmatmul.f32.vlgmr.msra.gmra.mxu1 %v2482_v1  ;;  %617 = vmatmul.f32.vlgmr.msra.gmra.mxu2 %v2482_v1  ;;  %v2550_v37 = vld [vmem:[%s2415_s1 + $0x10] sm:$0xff]  ;;  %3055 = vst [vmem:[#allocation31_spill] sm:$0xff] %v2568_v47  ;;  %v2570_v49 = vld [vmem:[#allocation12 + $0xb8] sm:$0xff]  ;;  %v486_v50 = vld [vmem:[#allocation10 + $0x88] sm:$0xff] }
  0x77   : > { %572 = vmatpush.msrb.mxu1 %v530_v2  ;;  %646 = vmatmul.f32.vlgmr.msra.gmra.mxu3 %v2482_v1  ;;  %3056 = vst [vmem:[#allocation32_spill] sm:$0xff] %v2570_v49  ;;  %v2575_v51 = vld [vmem:[#allocation12 + $0x90] sm:$0xff]  ;;  %v2577_v53 = vld [vmem:[#allocation12 + $0x98] sm:$0xff]  ;;  %v2583_v54 = vld [vmem:[%s2415_s1 + $0x18] sm:$0xff]  ;;  %s2227_s1 = smov [#allocation18]  }
  0x78   : > { %763 = vmatpush.msra.mxu0 %v2485_v3  ;;  %788 = vmatpush.msrb.mxu2 %v2487_v4  ;;  %3057 = vst [vmem:[#allocation33_spill] sm:$0xff] %v2575_v51  ;;  %v482_v55 = vld [vmem:[#allocation10 + $0x68] sm:$0xff]  ;;  %v2588_v57 = vld [vmem:[#allocation12 + $0x70] sm:$0xff]  ;;  %v2590_v58 = vld [vmem:[#allocation12 + $0x78] sm:$0xff]  ;;  %s1507_s21 = sshll.u32 %s2227_s1, 4  ;;  %s2153_s1 = scalar_lea.hbm %s3002_s8, 64  ;;  %s1508_s21 = int_to_ptr.vmem [resolvable:$true] %s1507_s21 }
  0x79   : > { %808 = vmatpush.msrb.mxu3 %v2491_v5  ;;  %573 = vmatpush.msrb.mxu1 %v526_v6  ;;  %3058 = vst [vmem:[#allocation34_spill] sm:$0xff] %v2577_v53  ;;  %v478_v59 = vld [vmem:[#allocation10 + $0x48] sm:$0xff]  ;;  %v2595_v61 = vld [vmem:[#allocation12 + $0x50] sm:$0xff]  ;;  %v2597_v62 = vld [vmem:[#allocation12 + $0x58] sm:$0xff] }
  0x7a   : > { %764 = vmatmul.f32.vlgmr.msra.gmra.mxu0 %v2494_v7  ;;  %789 = vmatpush.msrb.mxu2 %v2496_v9  ;;  %3059 = vst [vmem:[#allocation35_spill] sm:$0xff] %v2588_v57  ;;  %v474_v63 = vld [vmem:[#allocation10 + $0x28] sm:$0xff]  ;;  %v2601_v2 = vld [vmem:[#allocation12 + $0x30] sm:$0xff]  ;;  %v2603_v6 = vld [vmem:[#allocation12 + $0x38] sm:$0xff] }
  0x7b   : > { %809 = vmatpush.msrb.mxu3 %v2500_v10  ;;  %574 = vmatpush.msrb.mxu1 %v522_v11  ;;  %3060 = vst [vmem:[#allocation36_spill] sm:$0xff] %v2590_v58  ;;  %v470_v11 = vld [vmem:[#allocation10 + $0x8] sm:$0xff] }
  0x7c   : > { %790 = vmatpush.msrb.mxu2 %v2503_v13  ;;  %903 = vmatpush.msrb.mxu0 %v2437_v8  ;;  %3061 = vst [vmem:[#allocation37_spill] sm:$0xff] %v2595_v61 }
  0x7d   : > { %810 = vmatpush.msrb.mxu3 %v2507_v14  ;;  %575 = vmatpush.msrb.mxu1 %v518_v15  ;;  %3062 = vst [vmem:[#allocation38_spill] sm:$0xff] %v2597_v62  ;;  %v2608_v15 = vld [vmem:[#allocation12 + $0x10] sm:$0xff] }
  0x7e   : > { %791 = vmatpush.msrb.mxu2 %v2510_v17  ;;  %562 = vmatmul.f32.gmra.mxu1 %v2513_v18  ;;  %3063 = vst [vmem:[#allocation39_spill] sm:$0xff] %v2601_v2 }
  0x7f   : > { %811 = vmatpush.msrb.mxu3 %v2516_v19  ;;  %576 = vmatpush.msrb.mxu1 %v514_v21  ;;  %3064 = vst [vmem:[#allocation40_spill] sm:$0xff] %v2603_v6  ;;  %v2610_v21 = vld [vmem:[#allocation12 + $0x18] sm:$0xff] }
  0x80   : > { %620 = vmatmul.f32.gmra.mxu2 %v2513_v18  ;;  %649 = vmatmul.f32.gmra.mxu3 %v2513_v18  ;;  %3065 = vst [vmem:[#allocation41_spill] sm:$0xff] %v2608_v15 }
  0x81   : > { %792 = vmatpush.msrb.mxu2 %v2522_v22  ;;  %812 = vmatpush.msrb.mxu3 %v2524_v23  ;;  %3066 = vst [vmem:[#allocation42_spill] sm:$0xff] %v2610_v21 }
  0x82   : > { %577 = vmatpush.msrb.mxu1 %v510_v25  ;;  %904 = vmatpush.msrb.mxu0 %v2439_v12  ;;  %v2615_v25 = vld [vmem:[#allocation12 + $0x1e8] sm:$0xff] }
  0x83   : > { %793 = vmatpush.msrb.mxu2 %v2529_v26  ;;  %813 = vmatpush.msrb.mxu3 %v2531_v27 }
  0x84   : > { %578 = vmatpush.msrb.mxu1 %v506_v29  ;;  %905 = vmatpush.msrb.mxu0 %v2442_v16  ;;  %v2622_v29 = vld [vmem:[#allocation12 + $0x1c8] sm:$0xff] }
  0x85   : > { %794 = vmatpush.msrb.mxu2 %v2535_v30  ;;  %814 = vmatpush.msrb.mxu3 %v2537_v31 }
  0x86   : > { %579 = vmatpush.msrb.mxu1 %v502_v33  ;;  %906 = vmatpush.msrb.mxu0 %v2445_v20  ;;  %v2626_v33 = vld [vmem:[#allocation12 + $0x1a8] sm:$0xff] }
  0x87   : > { %795 = vmatpush.msrb.mxu2 %v2542_v34  ;;  %815 = vmatpush.msrb.mxu3 %v2544_v35 }
  0x88   : > { %565 = vmatmul.f32.gmra.mxu1 %v2550_v37  ;;  %623 = vmatmul.f32.gmra.mxu2 %v2550_v37 }
  0x89   : > { %580 = vmatpush.msrb.mxu1 %v498_v38  ;;  %652 = vmatmul.f32.gmra.mxu3 %v2550_v37  ;;  %v2632_v38 = vld [vmem:[#allocation12 + $0x188] sm:$0xff] }
  0x8a   : > { %796 = vmatpush.msrb.mxu2 %v2555_v39  ;;  %816 = vmatpush.msrb.mxu3 %v2557_v41 }
  0x8b   : > { %581 = vmatpush.msrb.mxu1 %v494_v42  ;;  %907 = vmatpush.msrb.mxu0 %v2448_v24  ;;  %v2645_v42 = vld [vmem:[#allocation12 + $0x148] sm:$0xff] }
  0x8c   : > { %797 = vmatpush.msrb.mxu2 %v2562_v43  ;;  %817 = vmatpush.msrb.mxu3 %v2564_v45 }
  0x8d   : > { %582 = vmatpush.msrb.mxu1 %v490_v46  ;;  %908 = vmatpush.msrb.mxu0 %v2451_v28  ;;  %v2650_v46 = vld [vmem:[#allocation12 + $0x128] sm:$0xff] }
  0x8e   : > { %798 = vmatpush.msrb.mxu2 %v2568_v47  ;;  %818 = vmatpush.msrb.mxu3 %v2570_v49 }
  0x8f   : > { %583 = vmatpush.msrb.mxu1 %v486_v50  ;;  %909 = vmatpush.msrb.mxu0 %v2454_v32  ;;  %v2656_v50 = vld [vmem:[#allocation12 + $0x108] sm:$0xff] }
  0x90   : > { %799 = vmatpush.msrb.mxu2 %v2575_v51  ;;  %819 = vmatpush.msrb.mxu3 %v2577_v53 }
  0x91   : > { %568 = vmatmul.f32.gmra.mxu1 %v2583_v54  ;;  %626 = vmatmul.f32.gmra.mxu2 %v2583_v54 }
  0x92   : > { %584 = vmatpush.msrb.mxu1 %v482_v55  ;;  %655 = vmatmul.f32.gmra.mxu3 %v2583_v54  ;;  %v2669_v55 = vld [vmem:[#allocation12 + $0xc8] sm:$0xff] }
  0x93   : > { %800 = vmatpush.msrb.mxu2 %v2588_v57  ;;  %820 = vmatpush.msrb.mxu3 %v2590_v58 }
  0x94   : > { %585 = vmatpush.msrb.mxu1 %v478_v59  ;;  %910 = vmatpush.msrb.mxu0 %v2457_v36  ;;  %v2674_v59 = vld [vmem:[#allocation12 + $0xa8] sm:$0xff] }
  0x95   : > { %801 = vmatpush.msrb.mxu2 %v2595_v61  ;;  %821 = vmatpush.msrb.mxu3 %v2597_v62  ;;  %3067 = vst [vmem:[#allocation43_spill] sm:$0xff] %v2674_v59 }
  0x96   : > { %586 = vmatpush.msrb.mxu1 %v474_v63  ;;  %911 = vmatpush.msrb.mxu0 %v2460_v40  ;;  %v2680_v63 = vld [vmem:[#allocation12 + $0x88] sm:$0xff] }
  0x97   : > { %802 = vmatpush.msrb.mxu2 %v2601_v2  ;;  %822 = vmatpush.msrb.mxu3 %v2603_v6  ;;  %3068 = vst [vmem:[#allocation44_spill] sm:$0xff] %v2680_v63 }
  0x98   : > { %587 = vmatpush.msrb.mxu1 %v470_v11  ;;  %912 = vmatpush.msrb.mxu0 %v2463_v44  ;;  %v2704_v11 = vld [vmem:[#allocation12 + $0x8] sm:$0xff] }
  0x99   : > { %803 = vmatpush.msrb.mxu2 %v2608_v15  ;;  %823 = vmatpush.msrb.mxu3 %v2610_v21  ;;  %3072 = vst [vmem:[#allocation48_spill] sm:$0xff] %v2704_v11 }
  0x9a   : > { %588 = vmatmul.f32.vlgmr.msrb.gmra.mxu1 %v2482_v1  ;;  %804 = vmatmul.f32.vlgmr.msrb.gmra.mxu2 %v2494_v7  ;;  %v2638_v1 = vld [vmem:[#allocation12 + $0x168] sm:$0xff] }
  0x9b   : > { %768 = vmatpush.msra.mxu1 %v2615_v25  ;;  %824 = vmatmul.f32.vlgmr.msrb.gmra.mxu3 %v2494_v7 }
  0x9c   : > { %943 = vmatpush.msra.mxu2 %v2487_v4  ;;  %963 = vmatpush.msra.mxu3 %v2491_v5 }
  0x9d   : > { %769 = vmatpush.msra.mxu1 %v2622_v29  ;;  %913 = vmatpush.msrb.mxu0 %v2466_v48 }
  0x9e   : > { %944 = vmatpush.msra.mxu2 %v2496_v9  ;;  %964 = vmatpush.msra.mxu3 %v2500_v10 }
  0x9f   : > { %770 = vmatpush.msra.mxu1 %v2626_v33  ;;  %914 = vmatpush.msrb.mxu0 %v2469_v52 }
  0xa0   : > { %945 = vmatpush.msra.mxu2 %v2503_v13  ;;  %965 = vmatpush.msra.mxu3 %v2507_v14 }
  0xa1   : > { %771 = vmatpush.msra.mxu1 %v2632_v38  ;;  %915 = vmatpush.msrb.mxu0 %v2472_v56 }
  0xa2   : > { %591 = vmatmul.f32.gmra.mxu1 %v2513_v18  ;;  %946 = vmatpush.msra.mxu2 %v2510_v17  ;;  %v2662_v18 = vld [vmem:[#allocation12 + $0xe8] sm:$0xff] }
  0xa3   : > { %772 = vmatpush.msra.mxu1 %v2638_v1  ;;  %966 = vmatpush.msra.mxu3 %v2516_v19 }
  0xa4   : > { %947 = vmatpush.msra.mxu2 %v2522_v22  ;;  %916 = vmatpush.msrb.mxu0 %v2475_v60 }
  0xa5   : > { %773 = vmatpush.msra.mxu1 %v2645_v42  ;;  %967 = vmatpush.msra.mxu3 %v2524_v23 }
  0xa6   : > { %948 = vmatpush.msra.mxu2 %v2529_v26  ;;  %917 = vmatpush.msrb.mxu0 %v2478_v0 }
  0xa7   : > { %774 = vmatpush.msra.mxu1 %v2650_v46  ;;  %968 = vmatpush.msra.mxu3 %v2531_v27 }
  0xa8   : > { %949 = vmatpush.msra.mxu2 %v2535_v30  ;;  %918 = vmatpush.msrb.mxu0 %v2485_v3 }
  0xa9   : > { %775 = vmatpush.msra.mxu1 %v2656_v50  ;;  %969 = vmatpush.msra.mxu3 %v2537_v31 }
  0xaa   : > { %594 = vmatmul.f32.gmra.mxu1 %v2550_v37  ;;  %950 = vmatpush.msra.mxu2 %v2542_v34  ;;  %v2686_v37 = vld [vmem:[#allocation12 + $0x68] sm:$0xff] }
  0xab   : > { %776 = vmatpush.msra.mxu1 %v2662_v18  ;;  %970 = vmatpush.msra.mxu3 %v2544_v35  ;;  %3069 = vst [vmem:[#allocation45_spill] sm:$0xff] %v2686_v37 }
  0xac   : > { %951 = vmatpush.msra.mxu2 %v2555_v39  ;;  %1059 = vmatpush.msra.mxu0 %v2437_v8  ;;  %v2693_v8 = vld [vmem:[#allocation12 + $0x48] sm:$0xff] }
  0xad   : > { %777 = vmatpush.msra.mxu1 %v2669_v55  ;;  %971 = vmatpush.msra.mxu3 %v2557_v41  ;;  %3070 = vst [vmem:[#allocation46_spill] sm:$0xff] %v2693_v8 }
  0xae   : > { %952 = vmatpush.msra.mxu2 %v2562_v43  ;;  %1060 = vmatpush.msra.mxu0 %v2439_v12  ;;  %v2698_v12 = vld [vmem:[#allocation12 + $0x28] sm:$0xff] }
  0xaf   : > { %778 = vmatpush.msra.mxu1 %v2674_v59  ;;  %972 = vmatpush.msra.mxu3 %v2564_v45  ;;  %3071 = vst [vmem:[#allocation47_spill] sm:$0xff] %v2698_v12 }
  0xb0   : > { %953 = vmatpush.msra.mxu2 %v2568_v47  ;;  %1061 = vmatpush.msra.mxu0 %v2442_v16 }
  0xb1   : > { %779 = vmatpush.msra.mxu1 %v2680_v63  ;;  %973 = vmatpush.msra.mxu3 %v2570_v49 }
  0xb2   : > { %597 = vmatmul.f32.gmra.mxu1 %v2583_v54  ;;  %954 = vmatpush.msra.mxu2 %v2575_v51  ;;  %v533_v54 = vld [vmem:[%s2999_s5] sm:$0xf] }
  0xb3   : > { %780 = vmatpush.msra.mxu1 %v2686_v37  ;;  %974 = vmatpush.msra.mxu3 %v2577_v53 }
  0xb4   : > { %955 = vmatpush.msra.mxu2 %v2588_v57  ;;  %1062 = vmatpush.msra.mxu0 %v2445_v20 }
  0xb5   : > { %781 = vmatpush.msra.mxu1 %v2693_v8  ;;  %975 = vmatpush.msra.mxu3 %v2590_v58 }
  0xb6   : > { %956 = vmatpush.msra.mxu2 %v2595_v61  ;;  %1063 = vmatpush.msra.mxu0 %v2448_v24 }
  0xb7   : > { %782 = vmatpush.msra.mxu1 %v2698_v12  ;;  %976 = vmatpush.msra.mxu3 %v2597_v62 }
  0xb8   : > { %957 = vmatpush.msra.mxu2 %v2601_v2  ;;  %1064 = vmatpush.msra.mxu0 %v2451_v28 }
  0xb9   : > { %783 = vmatpush.msra.mxu1 %v2704_v11  ;;  %977 = vmatpush.msra.mxu3 %v2603_v6 }
  0xba   : > { %784 = vmatmul.f32.vlgmr.msra.gmra.mxu1 %v2494_v7  ;;  %958 = vmatpush.msra.mxu2 %v2608_v15 }
  0xbb   : > { %923 = vmatpush.msrb.mxu1 %v2615_v25  ;;  %978 = vmatpush.msra.mxu3 %v2610_v21 }
  0xbc   : > { %1099 = vmatpush.msrb.mxu2 %v2487_v4  ;;  %1065 = vmatpush.msra.mxu0 %v2454_v32 }
  0xbd   : > { %1119 = vmatpush.msrb.mxu3 %v2491_v5  ;;  %924 = vmatpush.msrb.mxu1 %v2622_v29 }
  0xbe   : > { %1100 = vmatpush.msrb.mxu2 %v2496_v9  ;;  %1066 = vmatpush.msra.mxu0 %v2457_v36 }
  0xbf   : > { %1120 = vmatpush.msrb.mxu3 %v2500_v10  ;;  %925 = vmatpush.msrb.mxu1 %v2626_v33 }
  0xc0   : > { %1101 = vmatpush.msrb.mxu2 %v2503_v13  ;;  %1067 = vmatpush.msra.mxu0 %v2460_v40 }
  0xc1   : > { %1121 = vmatpush.msrb.mxu3 %v2507_v14  ;;  %926 = vmatpush.msrb.mxu1 %v2632_v38 }
  0xc2   : > { %1102 = vmatpush.msrb.mxu2 %v2510_v17  ;;  %1068 = vmatpush.msra.mxu0 %v2463_v44 }
  0xc3   : > { %1122 = vmatpush.msrb.mxu3 %v2516_v19  ;;  %927 = vmatpush.msrb.mxu1 %v2638_v1 }
  0xc4   : > { %1103 = vmatpush.msrb.mxu2 %v2522_v22  ;;  %1069 = vmatpush.msra.mxu0 %v2466_v48 }
  0xc5   : > { %1123 = vmatpush.msrb.mxu3 %v2524_v23  ;;  %928 = vmatpush.msrb.mxu1 %v2645_v42 }
  0xc6   : > { %1104 = vmatpush.msrb.mxu2 %v2529_v26  ;;  %1070 = vmatpush.msra.mxu0 %v2469_v52 }
  0xc7   : > { %1124 = vmatpush.msrb.mxu3 %v2531_v27  ;;  %929 = vmatpush.msrb.mxu1 %v2650_v46 }
  0xc8   : > { %1105 = vmatpush.msrb.mxu2 %v2535_v30  ;;  %1071 = vmatpush.msra.mxu0 %v2472_v56 }
  0xc9   : > { %1125 = vmatpush.msrb.mxu3 %v2537_v31  ;;  %930 = vmatpush.msrb.mxu1 %v2656_v50 }
  0xca   : > { %1106 = vmatpush.msrb.mxu2 %v2542_v34  ;;  %1072 = vmatpush.msra.mxu0 %v2475_v60 }
  0xcb   : > { %1126 = vmatpush.msrb.mxu3 %v2544_v35  ;;  %931 = vmatpush.msrb.mxu1 %v2662_v18 }
  0xcc   : > { %1107 = vmatpush.msrb.mxu2 %v2555_v39  ;;  %1073 = vmatpush.msra.mxu0 %v2478_v0  ;;  %v537_v0 = vperm.slane %v533_v54, 2 }
  0xcd   : > { %1127 = vmatpush.msrb.mxu3 %v2557_v41  ;;  %932 = vmatpush.msrb.mxu1 %v2669_v55 }
  0xce   : > { %1108 = vmatpush.msrb.mxu2 %v2562_v43  ;;  %1074 = vmatpush.msra.mxu0 %v2485_v3 }
  0xcf   : > { %1128 = vmatpush.msrb.mxu3 %v2564_v45  ;;  %933 = vmatpush.msrb.mxu1 %v2674_v59 }
  0xd0   : > { %1109 = vmatpush.msrb.mxu2 %v2568_v47 }
  0xd1   : > { %1129 = vmatpush.msrb.mxu3 %v2570_v49  ;;  %934 = vmatpush.msrb.mxu1 %v2680_v63 }
  0xd2   : > { %1110 = vmatpush.msrb.mxu2 %v2575_v51 }
  0xd3   : > { %1130 = vmatpush.msrb.mxu3 %v2577_v53  ;;  %935 = vmatpush.msrb.mxu1 %v2686_v37 }
  0xd4   : > { %1111 = vmatpush.msrb.mxu2 %v2588_v57 }
  0xd5   : > { %1131 = vmatpush.msrb.mxu3 %v2590_v58  ;;  %936 = vmatpush.msrb.mxu1 %v2693_v8 }
  0xd6   : > { %1112 = vmatpush.msrb.mxu2 %v2595_v61 }
  0xd7   : > { %1132 = vmatpush.msrb.mxu3 %v2597_v62  ;;  %937 = vmatpush.msrb.mxu1 %v2698_v12  ;;  %v538_v62 = vperm.slane %v533_v54, 3 }
  0xd8   : > { %1113 = vmatpush.msrb.mxu2 %v2601_v2 }
  0xd9   : > { %1133 = vmatpush.msrb.mxu3 %v2603_v6  ;;  %938 = vmatpush.msrb.mxu1 %v2704_v11 }
  0xda   : > { %1114 = vmatpush.msrb.mxu2 %v2608_v15  ;;  %v535_v15 = vperm.slane %v533_v54, 0 }
  0xdb   : > { %1079 = vmatpush.msra.mxu1 %v2615_v25  ;;  %1134 = vmatpush.msrb.mxu3 %v2610_v21 }
  0xdd   : > { %1080 = vmatpush.msra.mxu1 %v2622_v29 }
  0xdf   : > { %1081 = vmatpush.msra.mxu1 %v2626_v33 }
  0xe1   : > { %1082 = vmatpush.msra.mxu1 %v2632_v38 }
  0xe3   : > { %1083 = vmatpush.msra.mxu1 %v2638_v1 }
  0xe5   : > { %1084 = vmatpush.msra.mxu1 %v2645_v42 }
  0xe7   : > { %1085 = vmatpush.msra.mxu1 %v2650_v46 }
  0xe9   : > { %1086 = vmatpush.msra.mxu1 %v2656_v50 }
  0xeb   : > { %1087 = vmatpush.msra.mxu1 %v2662_v18 }
  0xed   : > { %1088 = vmatpush.msra.mxu1 %v2669_v55 }
  0xef   : > { %1089 = vmatpush.msra.mxu1 %v2674_v59 }
  0xf1   : > { %1090 = vmatpush.msra.mxu1 %v2680_v63 }
  0xf3   : > { %1091 = vmatpush.msra.mxu1 %v2686_v37  ;;  %v560_v7 = vpop.f32.mrf.mxu1 }
  0xf5   : > { %1092 = vmatpush.msra.mxu1 %v2693_v8 }
  0xf7   : > { %1093 = vmatpush.msra.mxu1 %v2698_v12 }
  0xf9   : > { %1094 = vmatpush.msra.mxu1 %v2704_v11  ;;  %v618_v21 = vpop.f32.mrf.mxu2 }
  0xfa   : > { %v647_v3 = vpop.f32.mrf.mxu3 }
  0xfb   : > { %v563_v6 = vpop.f32.mrf.mxu1 }
  0xfc   : > { %v2794_v2 = vadd.f32 %v563_v6, %v535_v15 }
  0xfe   : > { %3073 = vst [vmem:[#allocation49_spill] sm:$0xff] %v2794_v2 }
 0x103   : > { %v621_v61 = vpop.f32.mrf.mxu2  ;;  %v650_v60 = vpop.f32.mrf.mxu3 }
 0x104   : > { %v2796_v58 = vadd.f32 %v621_v61, %v537_v0  ;;  %v2798_v8 = vadd.f32 %v650_v60, %v538_v62 }
 0x105   : > { %v566_v12 = vpop.f32.mrf.mxu1 }
 0x106   : > { %3074 = vst [vmem:[#allocation50_spill] sm:$0xff] %v2796_v58  ;;  %v2800_v57 = vadd.f32 %v566_v12, %v535_v15  ;;  %v561_v12 = vadd.f32 %v560_v7, %v535_v15 }
 0x107   : > { %3075 = vst [vmem:[#allocation51_spill] sm:$0xff] %v2798_v8  ;;  %v536_v8 = vperm.slane %v533_v54, 1 }
 0x108   : > { %3076 = vst [vmem:[#allocation52_spill] sm:$0xff] %v2800_v57 }
 0x10b   : > { %v624_v37 = vpop.f32.mrf.mxu2 }
 0x10c   : > { %v2802_v56 = vadd.f32 %v624_v37, %v537_v0  ;;  %v653_v11 = vpop.f32.mrf.mxu3  ;;  %v765_v37 = vpop.f32.mrf.mxu0 }
 0x10d   : > { %v2804_v53 = vadd.f32 %v653_v11, %v538_v62 }
 0x10e   : > { %3077 = vst [vmem:[#allocation53_spill] sm:$0xff] %v2802_v56  ;;  %v569_v51 = vpop.f32.mrf.mxu1  ;;  %v828_v56 = vadd.f32 %v765_v37, %v561_v12 }
 0x10f   : > { %3078 = vst [vmem:[#allocation54_spill] sm:$0xff] %v2804_v53  ;;  %v2806_v6 = vadd.f32 %v569_v51, %v535_v15  ;;  %v619_v51 = vadd.f32 %v618_v21, %v537_v0 }
 0x110   : > { %v1674_v11 = vmul.f32 -1.442695, %v828_v56 }
 0x111   : > { %3079 = vst [vmem:[#allocation55_spill] sm:$0xff] %v2806_v6 }
 0x112   : > { %1815 = vpow2.f32 %v1674_v11 }
 0x114   : > { %v627_v2 = vpop.f32.mrf.mxu2 }
 0x115   : > { %v2808_v63 = vadd.f32 %v627_v2, %v537_v0  ;;  %v656_v52 = vpop.f32.mrf.mxu3 }
 0x116   : > { %v2810_v61 = vadd.f32 %v656_v52, %v538_v62 }
 0x117   : > { %3080 = vst [vmem:[#allocation56_spill] sm:$0xff] %v2808_v63  ;;  %v589_v60 = vpop.f32.mrf.mxu1 }
 0x118   : > { %3081 = vst [vmem:[#allocation57_spill] sm:$0xff] %v2810_v61  ;;  %v1816_v52 = vpop.eup %1815  ;;  %v590_v59 = vadd.f32 %v589_v60, %v536_v8 }
 0x119   : > { %v841_v54 = vadd.f32 1.0, %v1816_v52 }
 0x11b   : > { %vm849_vm1 = vweird.f32 %v841_v54 }
 0x11d   : > { %v805_v6 = vpop.f32.mrf.mxu2 }
 0x11e   : > { %v830_v2 = vadd.f32 %v805_v6, %v619_v51  ;;  %v648_v6 = vadd.f32 %v647_v3, %v538_v62  ;;  %v825_v11 = vpop.f32.mrf.mxu3 }
 0x11f   : > { %v592_v58 = vpop.f32.mrf.mxu1 }
 0x120   : > { %v2812_v57 = vadd.f32 %v592_v58, %v536_v8  ;;  %v1676_v61 = vmul.f32 -1.442695, %v830_v2  ;;  %v831_v51 = vadd.f32 %v825_v11, %v648_v6 }
 0x122   : > { %3082 = vst [vmem:[#allocation58_spill] sm:$0xff] %v2812_v57  ;;  %1817 = vpow2.f32 %v1676_v61 }
 0x123   : > { %1819 = vrcp.f32 %v841_v54 }
 0x127   : > { %v595_v49 = vpop.f32.mrf.mxu1 }
 0x128   : > { %v2814_v53 = vadd.f32 %v595_v49, %v536_v8  ;;  %v1818_v56 = vpop.eup %1817 }
 0x129   : > { %v1820_v49 = vpop.eup %1819  ;;  %v843_v12 = vadd.f32 1.0, %v1818_v56  ;;  %v853_v56 = vand.u32 2147483647, %v841_v54 }
 0x12a   : > { %3083 = vst [vmem:[#allocation59_spill] sm:$0xff] %v2814_v53  ;;  %v845_v21 = vmul.f32 %v1820_v49, %v841_v54  ;;  %vm850_vm0 = vweird.f32 %v1820_v49 }
 0x12b   : > { %vm851_vm3 = vmor %vm849_vm1, %vm850_vm0  ;;  %vm854_vm6 = vcmp.eq.f32.partialorder %v853_v56, 8.507059e+37  ;;  %vm879_vm8 = vweird.f32 %v843_v12 }
 0x12f   : > { %v598_v63 = vpop.f32.mrf.mxu1 }
 0x130   : > { %v2816_v47 = vadd.f32 %v598_v63, %v536_v8  ;;  %v846_v63 = vsub.f32 1.0, %v845_v21 }
 0x132   : > { %3084 = vst [vmem:[#allocation60_spill] sm:$0xff] %v2816_v47  ;;  %v847_v8 = vmul.f32 %v1820_v49, %v846_v63  ;;  %v740_v47 = vld [vmem:[#allocation18] sm:$0xff] }
 0x134   : > { %v848_v52 = vadd.f32 %v1820_v49, %v847_v8 }
 0x136   : > { %v852_v21 = vsel %vm851_vm3, %v1820_v49, %v848_v52 }
 0x137   : > { %v785_v58 = vpop.f32.mrf.mxu1 }
 0x138   : > { %v829_v15 = vadd.f32 %v785_v58, %v590_v59 }
 0x13a   : > { %v1675_v7 = vmul.f32 -1.442695, %v829_v15  ;;  %v855_v15 = vand.u32 2147483648, %v841_v54 }
 0x13c   : > { %1821 = vpow2.f32 %v1675_v7  ;;  %v856_v11 = vor.u32 1.1754944e-38, %v855_v15 }
 0x13d   : > { %1823 = vrcp.f32 %v843_v12 }
 0x13e   : > { %v857_v53 = vsel %vm854_vm6, %v856_v11, %v852_v21  ;;  %v3112_v21 = vld [vmem:[#allocation51_spill] sm:$0xff] }
 0x142   : > { %v1822_v0 = vpop.eup %1821 }
 0x143   : > { %v842_v37 = vadd.f32 1.0, %v1822_v0  ;;  %v1824_v2 = vpop.eup %1823 }
 0x144   : > { %v875_v59 = vmul.f32 %v1824_v2, %v843_v12  ;;  %vm880_vm9 = vweird.f32 %v1824_v2 }
 0x145   : > { %1825 = vrcp.f32 %v842_v37  ;;  %v870_v7 = vand.u32 2147483648, %v842_v37  ;;  %v868_v3 = vand.u32 2147483647, %v842_v37  ;;  %vm864_vm4 = vweird.f32 %v842_v37  ;;  %vm881_vm10 = vmor %vm879_vm8, %vm880_vm9 }
 0x146   : > { %1827 = vtanh.f32 %v831_v51  ;;  %v876_v62 = vsub.f32 1.0, %v875_v59  ;;  %v885_v59 = vand.u32 2147483648, %v843_v12 }
 0x147   : > { %v871_v51 = vor.u32 1.1754944e-38, %v870_v7  ;;  %vm869_vm7 = vcmp.eq.f32.partialorder %v868_v3, 8.507059e+37 }
 0x148   : > { %v886_v15 = vor.u32 1.1754944e-38, %v885_v59 }
 0x14b   : > { %v1826_v61 = vpop.eup %1825 }
 0x14c   : > { %v860_v60 = vmul.f32 %v1826_v61, %v842_v37  ;;  %vm865_vm2 = vweird.f32 %v1826_v61  ;;  %v1828_v63 = vpop.eup %1827  ;;  %v883_v37 = vand.u32 2147483647, %v843_v12 }
 0x14d   : > { %vm866_vm5 = vmor %vm864_vm4, %vm865_vm2  ;;  %v891_v54 = vmul.f32 %v1828_v63, %v857_v53  ;;  %v1896_v53 = vld [vmem:[#allocation12 + $0x1c0] sm:$0xff] }
 0x14e   : > { %v861_v58 = vsub.f32 1.0, %v860_v60  ;;  %v877_v60 = vmul.f32 %v1824_v2, %v876_v62  ;;  %vm884_vm11 = vcmp.eq.f32.partialorder %v883_v37, 8.507059e+37 }
 0x150   : > { %v862_v0 = vmul.f32 %v1826_v61, %v861_v58  ;;  %v878_v49 = vadd.f32 %v1824_v2, %v877_v60 }
 0x152   : > { %v863_v6 = vadd.f32 %v1826_v61, %v862_v0  ;;  %v882_v52 = vsel %vm881_vm10, %v1824_v2, %v878_v49 }
 0x153   : > { %v887_v7 = vsel %vm884_vm11, %v886_v15, %v882_v52 }
 0x154   : > { %v867_v8 = vsel %vm866_vm5, %v1826_v61, %v863_v6 }
 0x155   : > { %v872_v57 = vsel %vm869_vm7, %v871_v51, %v867_v8 }
 0x156   : > { %v890_v58 = vmul.f32 %v872_v57, %v740_v47  ;;  %v1895_v47 = vld [vmem:[#allocation12 + $0x1e0] sm:$0xff]  ;;  %v3110_v57 = vld [vmem:[#allocation58_spill] sm:$0xff] }
 0x158   : > { %v2818_v48 = vadd.f32 %v891_v54, %v890_v58 }
 0x15a   : > { %1829 = vtanh.f32 %v2818_v48 }
 0x160   : > { %v1830_v61 = vpop.eup %1829 }
 0x161   : > { %v2821_v56 = vmul.f32 %v1830_v61, %v887_v7 }
 0x163   : > { %919 = vmatmul.f32.vlgmr.msrb.gmra.mxu0 %v2821_v56  ;;  %939 = vmatmul.f32.vlgmr.msrb.gmra.mxu1 %v2821_v56 }
 0x164   : > { %959 = vmatmul.f32.vlgmr.msra.gmra.mxu2 %v2821_v56  ;;  %979 = vmatmul.f32.vlgmr.msra.gmra.mxu3 %v2821_v56 }
 0x165   : > { %1215 = vmatpush.msrb.mxu0 %v1895_v47  ;;  %1235 = vmatpush.msrb.mxu1 %v2615_v25 }
 0x166   : > { %1255 = vmatpush.msra.mxu2 %v2487_v4  ;;  %1275 = vmatpush.msra.mxu3 %v2491_v5  ;;  %v3093_v4 = vld [vmem:[#allocation27_spill] sm:$0xff]  ;;  %v3094_v5 = vld [vmem:[#allocation45_spill] sm:$0xff] }
 0x167   : > { %1216 = vmatpush.msrb.mxu0 %v1896_v53  ;;  %1236 = vmatpush.msrb.mxu1 %v2622_v29 }
 0x168   : > { %1256 = vmatpush.msra.mxu2 %v2496_v9  ;;  %1276 = vmatpush.msra.mxu3 %v2500_v10  ;;  %v3095_v9 = vld [vmem:[#allocation35_spill] sm:$0xff]  ;;  %v3096_v10 = vld [vmem:[#allocation36_spill] sm:$0xff] }
 0x169   : > { %1217 = vmatpush.msrb.mxu0 %v2442_v16  ;;  %1237 = vmatpush.msrb.mxu1 %v2626_v33  ;;  %v3085_v16 = vld [vmem:[#allocation25_spill] sm:$0xff] }
 0x16a   : > { %1257 = vmatpush.msra.mxu2 %v2503_v13  ;;  %1277 = vmatpush.msra.mxu3 %v2507_v14  ;;  %v3097_v13 = vld [vmem:[#allocation28_spill] sm:$0xff]  ;;  %v3098_v14 = vld [vmem:[#allocation46_spill] sm:$0xff] }
 0x16b   : > { %1218 = vmatpush.msrb.mxu0 %v2445_v20  ;;  %1238 = vmatpush.msrb.mxu1 %v2632_v38  ;;  %v3086_v20 = vld [vmem:[#allocation43_spill] sm:$0xff] }
 0x16c   : > { %1258 = vmatpush.msra.mxu2 %v2510_v17  ;;  %1278 = vmatpush.msra.mxu3 %v2516_v19  ;;  %v3099_v17 = vld [vmem:[#allocation37_spill] sm:$0xff]  ;;  %v3100_v19 = vld [vmem:[#allocation38_spill] sm:$0xff] }
 0x16d   : > { %1219 = vmatpush.msrb.mxu0 %v2448_v24  ;;  %1239 = vmatpush.msrb.mxu1 %v2638_v1  ;;  %v3087_v24 = vld [vmem:[#allocation31_spill] sm:$0xff]  ;;  %v3111_v1 = vld [vmem:[#allocation50_spill] sm:$0xff] }
 0x16e   : > { %1259 = vmatpush.msra.mxu2 %v2522_v22  ;;  %1279 = vmatpush.msra.mxu3 %v2524_v23  ;;  %v3101_v22 = vld [vmem:[#allocation29_spill] sm:$0xff]  ;;  %v3102_v23 = vld [vmem:[#allocation47_spill] sm:$0xff] }
 0x16f   : > { %1220 = vmatpush.msrb.mxu0 %v2451_v28  ;;  %1240 = vmatpush.msrb.mxu1 %v2645_v42  ;;  %v3088_v28 = vld [vmem:[#allocation32_spill] sm:$0xff] }
 0x170   : > { %1260 = vmatpush.msra.mxu2 %v2529_v26  ;;  %1280 = vmatpush.msra.mxu3 %v2531_v27  ;;  %v3103_v26 = vld [vmem:[#allocation39_spill] sm:$0xff]  ;;  %v3104_v27 = vld [vmem:[#allocation40_spill] sm:$0xff] }
 0x171   : > { %1221 = vmatpush.msrb.mxu0 %v2454_v32  ;;  %1241 = vmatpush.msrb.mxu1 %v2650_v46  ;;  %v3089_v32 = vld [vmem:[#allocation26_spill] sm:$0xff] }
 0x172   : > { %1261 = vmatpush.msra.mxu2 %v2535_v30  ;;  %1281 = vmatpush.msra.mxu3 %v2537_v31  ;;  %v3105_v30 = vld [vmem:[#allocation30_spill] sm:$0xff]  ;;  %v3106_v31 = vld [vmem:[#allocation48_spill] sm:$0xff] }
 0x173   : > { %1222 = vmatpush.msrb.mxu0 %v2457_v36  ;;  %1242 = vmatpush.msrb.mxu1 %v2656_v50  ;;  %v3090_v36 = vld [vmem:[#allocation44_spill] sm:$0xff] }
 0x174   : > { %1262 = vmatpush.msra.mxu2 %v2542_v34  ;;  %1282 = vmatpush.msra.mxu3 %v2544_v35  ;;  %v3107_v34 = vld [vmem:[#allocation41_spill] sm:$0xff]  ;;  %v3108_v35 = vld [vmem:[#allocation42_spill] sm:$0xff] }
 0x175   : > { %1223 = vmatpush.msrb.mxu0 %v2460_v40  ;;  %1243 = vmatpush.msrb.mxu1 %v2662_v18  ;;  %v3091_v40 = vld [vmem:[#allocation33_spill] sm:$0xff] }
 0x176   : > { %1263 = vmatpush.msra.mxu2 %v2555_v39  ;;  %1283 = vmatpush.msra.mxu3 %v2557_v41 }
 0x177   : > { %1224 = vmatpush.msrb.mxu0 %v2463_v44  ;;  %1244 = vmatpush.msrb.mxu1 %v2669_v55  ;;  %v3092_v44 = vld [vmem:[#allocation34_spill] sm:$0xff] }
 0x178   : > { %1264 = vmatpush.msra.mxu2 %v2562_v43  ;;  %1284 = vmatpush.msra.mxu3 %v2564_v45  ;;  %v3109_v43 = vld [vmem:[#allocation49_spill] sm:$0xff] }
 0x179   : > { %1225 = vmatpush.msrb.mxu0 %v3085_v16  ;;  %1245 = vmatpush.msrb.mxu1 %v3086_v20 }
 0x17a   : > { %1265 = vmatpush.msra.mxu2 %v3087_v24  ;;  %1285 = vmatpush.msra.mxu3 %v3088_v28 }
 0x17b   : > { %1226 = vmatpush.msrb.mxu0 %v3089_v32  ;;  %1246 = vmatpush.msrb.mxu1 %v3090_v36 }
 0x17c   : > { %1266 = vmatpush.msra.mxu2 %v3091_v40  ;;  %1286 = vmatpush.msra.mxu3 %v3092_v44 }
 0x17d   : > { %1227 = vmatpush.msrb.mxu0 %v3093_v4  ;;  %1247 = vmatpush.msrb.mxu1 %v3094_v5 }
 0x17e   : > { %1267 = vmatpush.msra.mxu2 %v3095_v9  ;;  %1287 = vmatpush.msra.mxu3 %v3096_v10 }
 0x17f   : > { %1228 = vmatpush.msrb.mxu0 %v3097_v13  ;;  %1248 = vmatpush.msrb.mxu1 %v3098_v14 }
 0x180   : > { %1268 = vmatpush.msra.mxu2 %v3099_v17  ;;  %1288 = vmatpush.msra.mxu3 %v3100_v19 }
 0x181   : > { %1229 = vmatpush.msrb.mxu0 %v3101_v22  ;;  %1249 = vmatpush.msrb.mxu1 %v3102_v23 }
 0x182   : > { %1269 = vmatpush.msra.mxu2 %v3103_v26  ;;  %1289 = vmatpush.msra.mxu3 %v3104_v27  ;;  %v1384_v27 = vld [vmem:[#allocation13 + $0x70] sm:$0xff] }
 0x183   : > { %1230 = vmatpush.msrb.mxu0 %v3105_v30  ;;  %1250 = vmatpush.msrb.mxu1 %v3106_v31  ;;  %v1383_v30 = vld [vmem:[#allocation13 + $0x68] sm:$0xff]  ;;  %v1382_v31 = vld [vmem:[#allocation13 + $0x60] sm:$0xff] }
 0x184   : > { %1270 = vmatpush.msra.mxu2 %v3107_v34  ;;  %1290 = vmatpush.msra.mxu3 %v3108_v35  ;;  %v1381_v34 = vld [vmem:[#allocation13 + $0x58] sm:$0xff] }
 0x1e0   : > { %v920_v39 = vpop.f32.mrf.mxu0  ;;  %v940_v41 = vpop.f32.mrf.mxu1 }
 0x1e1   : > { %v983_v45 = vadd.f32 %v920_v39, %v3109_v43  ;;  %v984_v25 = vadd.f32 %v940_v41, %v3110_v57  ;;  %v1380_v41 = vld [vmem:[#allocation13 + $0x50] sm:$0xff]  ;;  %v3113_v43 = vld [vmem:[#allocation52_spill] sm:$0xff]  ;;  %v3114_v57 = vld [vmem:[#allocation59_spill] sm:$0xff] }
 0x1e3   : > { %v1677_v29 = vmul.f32 -1.442695, %v983_v45  ;;  %v1678_v33 = vmul.f32 -1.442695, %v984_v25 }
 0x1e5   : > { %1831 = vpow2.f32 %v1677_v29  ;;  %v1379_v29 = vld [vmem:[#allocation13 + $0x48] sm:$0xff] }
 0x1e6   : > { %1833 = vpow2.f32 %v1678_v33 }
 0x1e7   : > { %v960_v38 = vpop.f32.mrf.mxu2  ;;  %v980_v2 = vpop.f32.mrf.mxu3 }
 0x1e8   : > { %v985_v42 = vadd.f32 %v960_v38, %v3111_v1  ;;  %v986_v6 = vadd.f32 %v980_v2, %v3112_v21  ;;  %v1378_v1 = vld [vmem:[#allocation13 + $0x40] sm:$0xff] }
 0x1ea   : > { %v1679_v46 = vmul.f32 -1.442695, %v985_v42  ;;  %v1377_v42 = vld [vmem:[#allocation13 + $0x38] sm:$0xff] }
 0x1eb   : > { %v1832_v50 = vpop.eup %1831 }
 0x1ec   : > { %v1834_v18 = vpop.eup %1833  ;;  %v996_v55 = vadd.f32 1.0, %v1832_v50  ;;  %1835 = vpow2.f32 %v1679_v46  ;;  %v1376_v46 = vld [vmem:[#allocation13 + $0x30] sm:$0xff] }
 0x1ed   : > { %v997_v12 = vadd.f32 1.0, %v1834_v18  ;;  %v3115_v18 = vld [vmem:[#allocation53_spill] sm:$0xff] }
 0x1ee   : > { %1837 = vrcp.f32 %v996_v55  ;;  %v1010_v54 = vand.u32 2147483648, %v996_v55  ;;  %v1008_v59 = vand.u32 2147483647, %v996_v55  ;;  %vm1004_vm14 = vweird.f32 %v996_v55 }
 0x1ef   : > { %1839 = vrcp.f32 %v997_v12  ;;  %v1025_v58 = vand.u32 2147483648, %v997_v12  ;;  %v1023_v52 = vand.u32 2147483647, %v997_v12  ;;  %vm1019_vm15 = vweird.f32 %v997_v12 }
 0x1f0   : > { %v1011_v47 = vor.u32 1.1754944e-38, %v1010_v54  ;;  %vm1009_vm2 = vcmp.eq.f32.partialorder %v1008_v59, 8.507059e+37  ;;  %v1370_v54 = vld [vmem:[#allocation13] sm:$0xff]  ;;  %v3116_v59 = vld [vmem:[#allocation54_spill] sm:$0xff] }
 0x1f1   : > { %v1026_v16 = vor.u32 1.1754944e-38, %v1025_v58  ;;  %vm1024_vm3 = vcmp.eq.f32.partialorder %v1023_v52, 8.507059e+37 }
 0x1f2   : > { %v1836_v0 = vpop.eup %1835 }
 0x1f3   : > { %v998_v3 = vadd.f32 1.0, %v1836_v0  ;;  %v1374_v0 = vld [vmem:[#allocation13 + $0x20] sm:$0xff] }
 0x1f4   : > { %v1838_v62 = vpop.eup %1837 }
 0x1f5   : > { %v1840_v63 = vpop.eup %1839  ;;  %v1000_v11 = vmul.f32 %v1838_v62, %v996_v55  ;;  %1841 = vrcp.f32 %v998_v3  ;;  %vm1005_vm12 = vweird.f32 %v1838_v62  ;;  %v1040_v13 = vand.u32 2147483648, %v998_v3 }
 0x1f6   : > { %v1015_v51 = vmul.f32 %v1840_v63, %v997_v12  ;;  %1843 = vtanh.f32 %v986_v6  ;;  %vm1020_vm13 = vweird.f32 %v1840_v63  ;;  %vm1006_vm0 = vmor %vm1004_vm14, %vm1005_vm12  ;;  %vm1034_vm5 = vweird.f32 %v998_v3  ;;  %v1375_v12 = vld [vmem:[#allocation13 + $0x28] sm:$0xff] }
 0x1f7   : > { %v1001_v8 = vsub.f32 1.0, %v1000_v11  ;;  %vm1021_vm1 = vmor %vm1019_vm15, %vm1020_vm13  ;;  %v1038_v14 = vand.u32 2147483647, %v998_v3  ;;  %v1041_v19 = vor.u32 1.1754944e-38, %v1040_v13  ;;  %v1372_v11 = vld [vmem:[#allocation13 + $0x10] sm:$0xff] }
 0x1f8   : > { %v1016_v60 = vsub.f32 1.0, %v1015_v51  ;;  %v1371_v51 = vld [vmem:[#allocation13 + $0x8] sm:$0xff] }
 0x1f9   : > { %v1002_v49 = vmul.f32 %v1838_v62, %v1001_v8  ;;  %vm1039_vm7 = vcmp.eq.f32.partialorder %v1038_v14, 8.507059e+37 }
 0x1fa   : > { %v1017_v37 = vmul.f32 %v1840_v63, %v1016_v60 }
 0x1fb   : > { %v1842_v15 = vpop.eup %1841  ;;  %v1003_v61 = vadd.f32 %v1838_v62, %v1002_v49 }
 0x1fc   : > { %v1030_v7 = vmul.f32 %v1842_v15, %v998_v3  ;;  %v1018_v53 = vadd.f32 %v1840_v63, %v1017_v37  ;;  %v1844_v24 = vpop.eup %1843  ;;  %vm1035_vm4 = vweird.f32 %v1842_v15 }
 0x1fd   : > { %v1007_v20 = vsel %vm1006_vm0, %v1838_v62, %v1003_v61  ;;  %vm1036_vm6 = vmor %vm1034_vm5, %vm1035_vm4 }
 0x1fe   : > { %v1031_v28 = vsub.f32 1.0, %v1030_v7  ;;  %v1012_v32 = vsel %vm1009_vm2, %v1011_v47, %v1007_v20  ;;  %v1022_v36 = vsel %vm1021_vm1, %v1840_v63, %v1018_v53  ;;  %v1373_v63 = vld [vmem:[#allocation13 + $0x18] sm:$0xff] }
 0x1ff   : > { %v1027_v40 = vsel %vm1024_vm3, %v1026_v16, %v1022_v36  ;;  %v1046_v44 = vmul.f32 %v1844_v24, %v1012_v32 }
 0x200   : > { %v1032_v4 = vmul.f32 %v1842_v15, %v1031_v28  ;;  %v1045_v5 = vmul.f32 %v1027_v40, %v2818_v48  ;;  %v1385_v48 = vld [vmem:[#allocation13 + $0x78] sm:$0xff] }
 0x202   : > { %v2894_v9 = vadd.f32 %v1046_v44, %v1045_v5  ;;  %v1033_v10 = vadd.f32 %v1842_v15, %v1032_v4 }
 0x204   : > { %1845 = vtanh.f32 %v2894_v9  ;;  %v1037_v17 = vsel %vm1036_vm6, %v1842_v15, %v1033_v10 }
 0x205   : > { %v1042_v23 = vsel %vm1039_vm7, %v1041_v19, %v1037_v17 }
 0x20a   : > { %v1846_v22 = vpop.eup %1845 }
 0x20b   : > { %v2897_v26 = vmul.f32 %v1846_v22, %v1042_v23 }
 0x20d   : > { %1075 = vmatmul.f32.vlgmr.msra.gmra.mxu0 %v2897_v26  ;;  %1095 = vmatmul.f32.vlgmr.msra.gmra.mxu1 %v2897_v26 }
 0x20e   : > { %1115 = vmatmul.f32.vlgmr.msrb.gmra.mxu2 %v2897_v26  ;;  %1135 = vmatmul.f32.vlgmr.msrb.gmra.mxu3 %v2897_v26 }
 0x20f   : > { %1390 = vmatpush.msra.mxu0 %v1385_v48 }
 0x211   : > { %1391 = vmatpush.msra.mxu0 %v1384_v27 }
 0x213   : > { %1392 = vmatpush.msra.mxu0 %v1383_v30 }
 0x215   : > { %1393 = vmatpush.msra.mxu0 %v1382_v31 }
 0x217   : > { %1394 = vmatpush.msra.mxu0 %v1381_v34 }
 0x219   : > { %1395 = vmatpush.msra.mxu0 %v1380_v41 }
 0x21b   : > { %1396 = vmatpush.msra.mxu0 %v1379_v29 }
 0x21d   : > { %1397 = vmatpush.msra.mxu0 %v1378_v1  ;;  %v3118_v1 = vld [vmem:[#allocation60_spill] sm:$0xff] }
 0x21f   : > { %1398 = vmatpush.msra.mxu0 %v1377_v42 }
 0x221   : > { %1399 = vmatpush.msra.mxu0 %v1376_v46 }
 0x223   : > { %1400 = vmatpush.msra.mxu0 %v1375_v12 }
 0x225   : > { %1401 = vmatpush.msra.mxu0 %v1374_v0 }
 0x227   : > { %1402 = vmatpush.msra.mxu0 %v1373_v63 }
 0x229   : > { %1403 = vmatpush.msra.mxu0 %v1372_v11 }
 0x22b   : > { %1404 = vmatpush.msra.mxu0 %v1371_v51 }
 0x22d   : > { %1405 = vmatpush.msra.mxu0 %v1370_v54 }
 0x28a   : > { %v1076_v35 = vpop.f32.mrf.mxu0  ;;  %v1096_v39 = vpop.f32.mrf.mxu1 }
 0x28b   : > { %v1139_v45 = vadd.f32 %v1076_v35, %v3113_v43  ;;  %v1140_v25 = vadd.f32 %v1096_v39, %v3114_v57 }
 0x28d   : > { %v1680_v33 = vmul.f32 -1.442695, %v1139_v45  ;;  %v1681_v38 = vmul.f32 -1.442695, %v1140_v25 }
 0x28f   : > { %1847 = vpow2.f32 %v1680_v33  ;;  %v3117_v33 = vld [vmem:[#allocation55_spill] sm:$0xff] }
 0x290   : > { %1849 = vpow2.f32 %v1681_v38 }
 0x291   : > { %v1116_v50 = vpop.f32.mrf.mxu2  ;;  %v1136_v8 = vpop.f32.mrf.mxu3 }
 0x292   : > { %v1141_v55 = vadd.f32 %v1116_v50, %v3115_v18  ;;  %v1142_v37 = vadd.f32 %v1136_v8, %v3116_v59  ;;  %v2918_v18 = vld [vmem:[%s3001_s7] ss:$0 sm:$0xff] }
 0x294   : > { %v1682_v2 = vmul.f32 -1.442695, %v1141_v55 }
 0x295   : > { %v1848_v3 = vpop.eup %1847 }
 0x296   : > { %v1850_v62 = vpop.eup %1849  ;;  %v1152_v21 = vadd.f32 1.0, %v1848_v3  ;;  %1851 = vpow2.f32 %v1682_v2 }
 0x297   : > { %v1153_v6 = vadd.f32 1.0, %v1850_v62 }
 0x298   : > { %1853 = vrcp.f32 %v1152_v21  ;;  %v1166_v53 = vand.u32 2147483648, %v1152_v21  ;;  %v1164_v24 = vand.u32 2147483647, %v1152_v21  ;;  %vm1160_vm10 = vweird.f32 %v1152_v21 }
 0x299   : > { %1855 = vrcp.f32 %v1153_v6  ;;  %v1181_v16 = vand.u32 2147483648, %v1153_v6  ;;  %v1179_v32 = vand.u32 2147483647, %v1153_v6  ;;  %vm1175_vm11 = vweird.f32 %v1153_v6 }
 0x29a   : > { %v1167_v4 = vor.u32 1.1754944e-38, %v1166_v53  ;;  %vm1165_vm14 = vcmp.eq.f32.partialorder %v1164_v24, 8.507059e+37 }
 0x29b   : > { %v1182_v10 = vor.u32 1.1754944e-38, %v1181_v16  ;;  %vm1180_vm15 = vcmp.eq.f32.partialorder %v1179_v32, 8.507059e+37 }
 0x29c   : > { %v1852_v60 = vpop.eup %1851 }
 0x29d   : > { %v1154_v58 = vadd.f32 1.0, %v1852_v60 }
 0x29e   : > { %v1854_v49 = vpop.eup %1853 }
 0x29f   : > { %v1856_v52 = vpop.eup %1855  ;;  %v1156_v15 = vmul.f32 %v1854_v49, %v1152_v21  ;;  %1857 = vrcp.f32 %v1154_v58  ;;  %vm1161_vm8 = vweird.f32 %v1854_v49  ;;  %v1196_v35 = vand.u32 2147483648, %v1154_v58 }
 0x2a0   : > { %v1171_v61 = vmul.f32 %v1856_v52, %v1153_v6  ;;  %1859 = vtanh.f32 %v1142_v37  ;;  %vm1176_vm9 = vweird.f32 %v1856_v52  ;;  %vm1162_vm12 = vmor %vm1160_vm10, %vm1161_vm8  ;;  %vm1190_vm1 = vweird.f32 %v1154_v58 }
 0x2a1   : > { %v1157_v7 = vsub.f32 1.0, %v1156_v15  ;;  %vm1177_vm13 = vmor %vm1175_vm11, %vm1176_vm9  ;;  %v1194_v39 = vand.u32 2147483647, %v1154_v58  ;;  %v1197_v43 = vor.u32 1.1754944e-38, %v1196_v35 }
 0x2a2   : > { %v1172_v47 = vsub.f32 1.0, %v1171_v61 }
 0x2a3   : > { %v1158_v20 = vmul.f32 %v1854_v49, %v1157_v7  ;;  %vm1195_vm3 = vcmp.eq.f32.partialorder %v1194_v39, 8.507059e+37 }
 0x2a4   : > { %v1173_v28 = vmul.f32 %v1856_v52, %v1172_v47 }
 0x2a5   : > { %v1858_v36 = vpop.eup %1857  ;;  %v1159_v40 = vadd.f32 %v1854_v49, %v1158_v20 }
 0x2a6   : > { %v1186_v44 = vmul.f32 %v1858_v36, %v1154_v58  ;;  %v1174_v5 = vadd.f32 %v1856_v52, %v1173_v28  ;;  %v1860_v14 = vpop.eup %1859  ;;  %vm1191_vm0 = vweird.f32 %v1858_v36  ;;  %v3120_v58 = vld [vmem:[#allocation57_spill] sm:$0xff] }
 0x2a7   : > { %v1163_v13 = vsel %vm1162_vm12, %v1854_v49, %v1159_v40  ;;  %vm1192_vm2 = vmor %vm1190_vm1, %vm1191_vm0 }
 0x2a8   : > { %v1187_v17 = vsub.f32 1.0, %v1186_v44  ;;  %v1168_v19 = vsel %vm1165_vm14, %v1167_v4, %v1163_v13  ;;  %v1178_v22 = vsel %vm1177_vm13, %v1856_v52, %v1174_v5 }
 0x2a9   : > { %v1183_v23 = vsel %vm1180_vm15, %v1182_v10, %v1178_v22  ;;  %v1202_v48 = vmul.f32 %v1860_v14, %v1168_v19 }
 0x2aa   : > { %v1188_v27 = vmul.f32 %v1858_v36, %v1187_v17  ;;  %v1201_v30 = vmul.f32 %v1183_v23, %v2894_v9 }
 0x2ac   : > { %v2908_v31 = vadd.f32 %v1202_v48, %v1201_v30  ;;  %v1189_v34 = vadd.f32 %v1858_v36, %v1188_v27 }
 0x2ae   : > { %1861 = vtanh.f32 %v2908_v31  ;;  %v1193_v41 = vsel %vm1192_vm2, %v1858_v36, %v1189_v34 }
 0x2af   : > { %v1198_v57 = vsel %vm1195_vm3, %v1197_v43, %v1193_v41 }
 0x2b4   : > { %v1862_v45 = vpop.eup %1861 }
 0x2b5   : > { %v1205_v25 = vmul.f32 %v1862_v45, %v1198_v57 }
 0x2b7   : > { %1231 = vmatmul.f32.vlgmr.msrb.gmra.mxu0 %v1205_v25  ;;  %1251 = vmatmul.f32.vlgmr.msrb.gmra.mxu1 %v1205_v25 }
 0x2b8   : > { %1271 = vmatmul.f32.vlgmr.msra.gmra.mxu2 %v1205_v25  ;;  %1291 = vmatmul.f32.vlgmr.msra.gmra.mxu3 %v1205_v25 }
 0x2bf   : > { %1406 = vmatmul.f32.vlgmr.msra.gmra.mxu0 %v2821_v56  ;;  %v3119_v56 = vld [vmem:[#allocation56_spill] sm:$0xff] }
 0x2c7   : > { %1409 = vmatmul.f32.gmra.mxu0 %v2897_v26 }
 0x2cf   : > { %1412 = vmatmul.f32.gmra.mxu0 %v1205_v25 }
 0x334   : > { %v1232_v9 = vpop.f32.mrf.mxu0  ;;  %v1252_v29 = vpop.f32.mrf.mxu1 }
 0x335   : > { %v1295_v38 = vadd.f32 %v1232_v9, %v3117_v33  ;;  %v1296_v42 = vadd.f32 %v1252_v29, %v3118_v1 }
 0x337   : > { %v1683_v46 = vmul.f32 -1.442695, %v1295_v38  ;;  %v1684_v50 = vmul.f32 -1.442695, %v1296_v42 }
 0x339   : > { %1863 = vpow2.f32 %v1683_v46 }
 0x33a   : > { %1865 = vpow2.f32 %v1684_v50 }
 0x33b   : > { %v1272_v55 = vpop.f32.mrf.mxu2  ;;  %v1292_v11 = vpop.f32.mrf.mxu3 }
 0x33c   : > { %v1297_v12 = vadd.f32 %v1272_v55, %v3119_v56  ;;  %v1407_v26 = vpop.f32.mrf.mxu0  ;;  %v1298_v49 = vadd.f32 %v1292_v11, %v3120_v58 }
 0x33d   : > { %v2922_v2 = vadd.f32 %v2918_v18, %v1407_v26 }
 0x33e   : > { %v1685_v0 = vmul.f32 -1.442695, %v1297_v12 }
 0x33f   : > { %v1864_v3 = vpop.eup %1863  ;;  %1419 = vmax.xlane.f32.xlu0 %v2922_v2 }
 0x340   : > { %v1866_v62 = vpop.eup %1865  ;;  %v1308_v21 = vadd.f32 1.0, %v1864_v3  ;;  %1867 = vpow2.f32 %v1685_v0 }
 0x341   : > { %v1309_v6 = vadd.f32 1.0, %v1866_v62 }
 0x342   : > { %1869 = vrcp.f32 %v1308_v21  ;;  %v1320_v7 = vand.u32 2147483647, %v1308_v21  ;;  %v1322_v47 = vand.u32 2147483648, %v1308_v21  ;;  %vm1316_vm6 = vweird.f32 %v1308_v21 }
 0x343   : > { %1871 = vrcp.f32 %v1309_v6  ;;  %v1337_v16 = vand.u32 2147483648, %v1309_v6  ;;  %v1335_v32 = vand.u32 2147483647, %v1309_v6  ;;  %vm1331_vm7 = vweird.f32 %v1309_v6 }
 0x344   : > { %v1410_v63 = vpop.f32.mrf.mxu0  ;;  %v1323_v44 = vor.u32 1.1754944e-38, %v1322_v47  ;;  %vm1321_vm10 = vcmp.eq.f32.partialorder %v1320_v7, 8.507059e+37 }
 0x345   : > { %v2926_v51 = vadd.f32 %v2918_v18, %v1410_v63  ;;  %v1338_v10 = vor.u32 1.1754944e-38, %v1337_v16  ;;  %vm1336_vm11 = vcmp.eq.f32.partialorder %v1335_v32, 8.507059e+37 }
 0x346   : > { %v1868_v8 = vpop.eup %1867 }
 0x347   : > { %v1310_v60 = vadd.f32 1.0, %v1868_v8  ;;  %1421 = vmax.xlane.f32.xlu0 %v2926_v51 }
 0x348   : > { %v1870_v54 = vpop.eup %1869 }
 0x349   : > { %v1872_v59 = vpop.eup %1871  ;;  %v1312_v37 = vmul.f32 %v1870_v54, %v1308_v21  ;;  %1873 = vrcp.f32 %v1310_v60  ;;  %vm1317_vm4 = vweird.f32 %v1870_v54  ;;  %v1352_v39 = vand.u32 2147483648, %v1310_v60 }
 0x34a   : > { %v1327_v52 = vmul.f32 %v1872_v59, %v1309_v6  ;;  %1875 = vtanh.f32 %v1298_v49  ;;  %vm1332_vm5 = vweird.f32 %v1872_v59  ;;  %vm1318_vm8 = vmor %vm1316_vm6, %vm1317_vm4  ;;  %vm1346_vm13 = vweird.f32 %v1310_v60 }
 0x34b   : > { %v1313_v15 = vsub.f32 1.0, %v1312_v37  ;;  %vm1333_vm9 = vmor %vm1331_vm7, %vm1332_vm5  ;;  %v1350_v41 = vand.u32 2147483647, %v1310_v60  ;;  %v1353_v45 = vor.u32 1.1754944e-38, %v1352_v39 }
 0x34c   : > { %v1328_v61 = vsub.f32 1.0, %v1327_v52  ;;  %v1413_v53 = vpop.f32.mrf.mxu0 }
 0x34d   : > { %v1314_v20 = vmul.f32 %v1870_v54, %v1313_v15  ;;  %v2931_v24 = vadd.f32 %v2918_v18, %v1413_v53  ;;  %vm1351_vm15 = vcmp.eq.f32.partialorder %v1350_v41, 8.507059e+37 }
 0x34e   : > { %v1329_v28 = vmul.f32 %v1872_v59, %v1328_v61 }
 0x34f   : > { %v1874_v36 = vpop.eup %1873  ;;  %v1315_v40 = vadd.f32 %v1870_v54, %v1314_v20  ;;  %1423 = vmax.xlane.f32.xlu1 %v2931_v24 }
 0x350   : > { %v1330_v4 = vadd.f32 %v1872_v59, %v1329_v28  ;;  %v1342_v5 = vmul.f32 %v1874_v36, %v1310_v60  ;;  %v1876_v14 = vpop.eup %1875  ;;  %vm1347_vm12 = vweird.f32 %v1874_v36 }
 0x351   : > { %v1319_v13 = vsel %vm1318_vm8, %v1870_v54, %v1315_v40  ;;  %vm1348_vm14 = vmor %vm1346_vm13, %vm1347_vm12 }
 0x352   : > { %v1324_v17 = vsel %vm1321_vm10, %v1323_v44, %v1319_v13  ;;  %v1334_v19 = vsel %vm1333_vm9, %v1872_v59, %v1330_v4  ;;  %v1343_v22 = vsub.f32 1.0, %v1342_v5 }
 0x353   : > { %v1339_v23 = vsel %vm1336_vm11, %v1338_v10, %v1334_v19  ;;  %v1358_v48 = vmul.f32 %v1876_v14, %v1324_v17 }
 0x354   : > { %v1357_v27 = vmul.f32 %v1339_v23, %v2908_v31  ;;  %v1344_v30 = vmul.f32 %v1874_v36, %v1343_v22 }
 0x356   : > { %v1359_v34 = vadd.f32 %v1358_v48, %v1357_v27  ;;  %v1345_v35 = vadd.f32 %v1874_v36, %v1344_v30 }
 0x358   : > { %1365 = vst [vmem:[#allocation18] sm:$0xff] %v1359_v34  ;;  %1877 = vtanh.f32 %v1359_v34  ;;  %v1349_v43 = vsel %vm1348_vm14, %v1874_v36, %v1345_v35 }
 0x359   : > { %v1354_v25 = vsel %vm1351_vm15, %v1353_v45, %v1349_v43 }
 0x35e   : > { %v1878_v57 = vpop.eup %1877 }
 0x35f   : > { %v1361_v9 = vmul.f32 %v1878_v57, %v1354_v25 }
 0x361   : > { %1415 = vmatmul.f32.gmra.mxu0 %v1361_v9  ;;  %1364 = vst [vmem:[#allocation16] sm:$0xff] %v1361_v9 }
 0x362   : > { %1721 = dma.vmem_to_hbm [thread:$0]  (%p3121_p1), %s1496_s18, 128, %s1498_s23, [#allocation17]  }
 0x363   : > { %1723 = dma.vmem_to_hbm [thread:$0]  (%p3122_p4), %s1508_s21, 128, %s1510_s4, [#allocation17]  }
 0x364   : > { %s1480_s18 = sshll.u32 %s2433_s2, 4  ;;  %s2147_s23 = sshra.s32 %s1483_s29, 4  ;;  %s1481_s18 = int_to_ptr.vmem [resolvable:$true] %s1480_s18  ;;  %s2148_s23 = int_to_ptr.hbm [resolvable:$true] %s2147_s23 }
 0x365   : > { %s2149_s30 = scalar_lea.hbm %s2148_s23, 32  ;;  %p2154_p8 = scmp.lt.s32.totalorder %s2148_s23, %s3002_s8 }
 0x366   : > { %p2150_p12 = scmp.ne.s32.totalorder %s2148_s23, %s2149_s30  ;;  %p2155_p10 = scmp.lt.s32.totalorder %s2153_s1, %s2149_s30 }
 0x368   : > { %p2151_p13 = pnand %p2150_p12, %p2377_p0  ;;  %p2156_p11 = por %p2155_p10, %p2154_p8 }
 0x36a   : > { %p2152_p9 = pneg %p2151_p13 }
 0x36c   : > { %p2157_p2 = pnand %p2156_p11, %p2152_p9 }
 0x3b2   : > { %v1420_v29 = vpop.xlane.xlu0 %1419 }
 0x3b3   : > { %v1427_v31 = vsub.f32 %v2922_v2, %v1420_v29 }
 0x3b5   : > { %v1431_v33 = vmul.f32 1.442695, %v1427_v31 }
 0x3b7   : > { %1879 = vpow2.f32 %v1431_v33 }
 0x3ba   : > { %v1422_v38 = vpop.xlane.xlu0 %1421 }
 0x3bb   : > { %v1428_v1 = vsub.f32 %v2926_v51, %v1422_v38 }
 0x3bd   : > { %v1880_v42 = vpop.eup %1879  ;;  %v1433_v46 = vmul.f32 1.442695, %v1428_v1 }
 0x3be   : > { %1439 = vadd.xlane.f32.xlu2 %v1880_v42 }
 0x3bf   : > { %1881 = vpow2.f32 %v1433_v46 }
 0x3c2   : > { %v1424_v50 = vpop.xlane.xlu1 %1423 }
 0x3c3   : > { %v1429_v55 = vsub.f32 %v2931_v24, %v1424_v50 }
 0x3c5   : > { %v1882_v56 = vpop.eup %1881  ;;  %v1435_v12 = vmul.f32 1.442695, %v1429_v55 }
 0x3c6   : > { %1441 = vadd.xlane.f32.xlu2 %v1882_v56 }
 0x3c7   : > { %1883 = vpow2.f32 %v1435_v12 }
 0x3cd   : > { %v1884_v26 = vpop.eup %1883 }
 0x3ce   : > { %1443 = vadd.xlane.f32.xlu0 %v1884_v26 }
 0x3de   : > { %v1416_v0 = vpop.f32.mrf.mxu0 }
 0x3df   : > { %v1417_v3 = vadd.f32 %v2918_v18, %v1416_v0 }
 0x3e1   : > { %1425 = vmax.xlane.f32.xlu1 %v1417_v3 }
 0x431   : > { %v1440_v62 = vpop.xlane.xlu2 %1439 }
 0x432   : > { %1885 = vlog2.f32 %v1440_v62 }
 0x438   : > { %v1886_v21 = vpop.eup %1885 }
 0x439   : > { %v1448_v6 = vmul.f32 0.6931472, %v1886_v21  ;;  %v1442_v63 = vpop.xlane.xlu2 %1441 }
 0x43a   : > { %1887 = vlog2.f32 %v1442_v63 }
 0x43b   : > { %v1455_v11 = vadd.f32 %v1448_v6, %v1420_v29 }
 0x43d   : > { %v1459_v8 = vsub.f32 %v2922_v2, %v1455_v11 }
 0x43f   : > { %1463 = vst [vmem:[%s2433_s2] sm:$0xff] %v1459_v8 }
 0x440   : > { %v1888_v60 = vpop.eup %1887 }
 0x441   : > { %v1450_v54 = vmul.f32 0.6931472, %v1888_v60  ;;  %v1444_v58 = vpop.xlane.xlu0 %1443 }
 0x442   : > { %1889 = vlog2.f32 %v1444_v58 }
 0x443   : > { %v1456_v49 = vadd.f32 %v1450_v54, %v1422_v38 }
 0x445   : > { %v1460_v18 = vsub.f32 %v2926_v51, %v1456_v49 }
 0x447   : > { %1464 = vst [vmem:[%s2433_s2 + $0x8] sm:$0xff] %v1460_v18 }
 0x448   : > { %v1890_v59 = vpop.eup %1889 }
 0x449   : > { %v1452_v37 = vmul.f32 0.6931472, %v1890_v59 }
 0x44b   : > { %v1457_v52 = vadd.f32 %v1452_v37, %v1424_v50 }
 0x44d   : > { %v1461_v15 = vsub.f32 %v2931_v24, %v1457_v52 }
 0x44f   : > { %1465 = vst [vmem:[%s2433_s2 + $0x10] sm:$0xff] %v1461_v15 }
 0x454   : > { %v1426_v61 = vpop.xlane.xlu1 %1425 }
 0x455   : > { %v1430_v7 = vsub.f32 %v1417_v3, %v1426_v61 }
 0x457   : > { %v1437_v2 = vmul.f32 1.442695, %v1430_v7 }
 0x459   : > { %1891 = vpow2.f32 %v1437_v2 }
 0x45f   : > { %v1892_v47 = vpop.eup %1891 }
 0x460   : > { %1445 = vadd.xlane.f32.xlu1 %v1892_v47 }
 0x4d3   : > { %v1446_v51 = vpop.xlane.xlu1 %1445 }
 0x4d4   : > { %1893 = vlog2.f32 %v1446_v51 }
 0x4da   : > { %v1894_v53 = vpop.eup %1893 }
 0x4db   : > { %v1454_v16 = vmul.f32 0.6931472, %v1894_v53 }
 0x4dd   : > { %v1458_v20 = vadd.f32 %v1454_v16, %v1426_v61 }
 0x4df   : > { %v1462_v24 = vsub.f32 %v1417_v3, %v1458_v20 }
 0x4e1   : > { %1466 = vst [vmem:[%s2433_s2 + $0x18] sm:$0xff] %v1462_v24 }
 0x4e2   : > { %2160 = shalt.err (!%p2157_p2)
}
 0x4e3   : > { %s2228_s12 = smov 128   ;;  %s2229_s2 = smov 8  }
 0x4e4   : > { %1719 = dma.vmem_to_hbm [thread:$0]  (%p2377_p0), %s1481_s18, 512, %s1483_s29, %s1468_s17, %s2228_s12, %s2228_s12, %s2229_s2  }
 0x4e5   : > { %p3123_p5 = pmov %p3121_p1 }
 0x4e6   : > { %p3124_p6 = pmov %p3121_p1 }
 0x4e7   : > { %2194 = dma.done.wait (%p3123_p5), [#allocation17], 256  }
 0x4e8   : > { %2196 = vsyncadd (%p3124_p6), [#allocation17], 4294967040 }
 0x4e9 PF: > { %s1531_s27 = sand.u32 1, %s2203_s13   ;;  %p3125_p3 = scmp.ge.s32.totalorder %s2215_s16, 2 }
 0x4ea   : > { %s1532_s11 = scalar_lea.sflag [#allocation6], %s1531_s27 }
 0x4eb   : > { %p1750_p1 = pnand %p3125_p3, %p2382_p7 }
 0x4ed   : > { %p1751_p4 = pneg %p1750_p1 }
 0x4ef   : > { %2198 = dma.done.wait (%p1751_p4), %s1532_s11, 512  }
 0x4f0   : > { %2200 = vsyncadd (%p1751_p4), %s1532_s11, 4294966784  ;;  %p28_p0 = scmp.ge.s32.totalorder %s2355_s25, 4   ;;  %s3126_s13 = smov %s2207_s14 }
 0x4f1   : > { %s3127_s14 = smov %s2211_s15  ;;  %s3128_s15 = smov %s2367_s28 }
 0x4f2   : > { %s3129_s16 = smov %s2355_s25  ;;  %30 = sbr.rel (!%p28_p0) target bundleno = 14 (0xe), region = 144 }
 0x4f7   :  { %1538 = vsyncpa [#allocation5], 1 }
 0x4f8   :  { %1540 = vsyncpa [#allocation5 + $0x1], 1 }
 0x4f9   :  { %1541 = vsyncpa [#allocation8], 1 }
 0x4fa   :  { %1542 = vsyncpa [#allocation11], 1 }
 0x4fb   :  { %1543 = vsyncpa [#allocation14], 1 }
 0x4fc   :  { %1544 = vsyncpa [#allocation6], 1 }
 0x4fd   :  { %1546 = vsyncpa [#allocation6 + $0x1], 1 }
 0x4fe   :  { %1547 = vsyncpa [#allocation17], 1 }

</bundles_post_ra>
